<compile_context>
chip_gen: v7x
topology: tpu7x:2x2x1
jax: 0.10.0
libtpu: 0.0.40
codegen_flags: <defaults>
</compile_context>

<pallas_src>
import functools

import jax
import jax.numpy as jnp
from jax.experimental import pallas as pl
from jax.experimental.pallas import tpu as pltpu


_IN_PAD = 64        # padded contraction dim for fc1 (63 -> 64)
_CLS_PAD = 128      # padded classifier width (5 -> 128), lane-dense output
_TILE_B_MAX = 512   # large tiles fill the 256-wide MXU (v6e/v7x) & amortize step cost
_NEG = -1e30        # "minus infinity" bias for padded classifier columns
_LAYERS = ("1", "2", "3", "4", "5", "c")


def _linear_relu(h_bf16, w_ref, b_ref):
    """y = relu(h @ W + b); f32 accumulate / f32 elementwise, bf16 out for next dot."""
    y = jnp.dot(h_bf16, w_ref[...], preferred_element_type=jnp.float32)
    y = jnp.maximum(y + b_ref[...], 0.0)  # bias broadcast over batch rows
    return y.astype(jnp.bfloat16)


def _gesture_kernel(
    x_ref,
    w1_ref, b1_ref,
    w2_ref, b2_ref,
    w3_ref, b3_ref,
    w4_ref, b4_ref,
    w5_ref, b5_ref,
    wc_ref, bc_ref,
    out_ref,
):
    """Fused forward: 5x (Linear+ReLU) -> Linear -> softmax (dropout = identity)."""
    h = x_ref[...]  # already bf16, features padded 63 -> 64 with zeros

    h = _linear_relu(h, w1_ref, b1_ref)
    h = _linear_relu(h, w2_ref, b2_ref)
    h = _linear_relu(h, w3_ref, b3_ref)
    h = _linear_relu(h, w4_ref, b4_ref)
    h = _linear_relu(h, w5_ref, b5_ref)

    # classifier (no ReLU); padded columns carry a -1e30 bias so exp() -> 0
    logits = jnp.dot(h, wc_ref[...], preferred_element_type=jnp.float32)
    logits = logits + bc_ref[...]

    # numerically-stable softmax over the (padded) class axis, EXACT normalization
    m = jnp.max(logits, axis=-1, keepdims=True)
    e = jnp.exp(logits - m)
    denom = jnp.sum(e, axis=-1, keepdims=True)
    out_ref[...] = (e / denom).astype(out_ref.dtype)


def _round_up(x, m):
    return (x + m - 1) // m * m


@functools.partial(jax.jit, static_argnames=("num_classes",))
def gesture_net_forward(x, params, num_classes=5):
    """x: (B, in_features) float32.  params: padded bf16 weights + f32 biases."""
    batch, in_f = x.shape
    in_pad = params["w1"].shape[0]
    cls_pad = params["wc"].shape[1]

    # --- batch tiling --------------------------------------------------------
    # rows padded to a multiple of 16 (bf16 sublane packing); tiles <= 512 rows;
    # >= 2 tiles whenever the batch allows, so both v7x TensorCores run.
    b_pad = _round_up(max(batch, 16), 16)
    num_tiles = -(-b_pad // _TILE_B_MAX)
    if num_tiles == 1 and b_pad >= 32:
        num_tiles = 2
    tile_b = _round_up(-(-b_pad // num_tiles), 16)
    b_pad = tile_b * num_tiles

    # pad features 63 -> 64 and cast to bf16 in a single wrapper step
    x_p = jnp.pad(
        x.astype(jnp.bfloat16), ((0, b_pad - batch), (0, in_pad - in_f))
    )

    args = [x_p]
    in_specs = [pl.BlockSpec((tile_b, in_pad), lambda i: (i, 0))]
    for name in _LAYERS:
        w = params[f"w{name}"]
        b = params[f"b{name}"]
        args += [w, b]
        # constant index_map: weights/biases stay VMEM-resident across batch
        # tiles; single-buffered since they are never re-fetched.
        in_specs += [
            pl.BlockSpec(w.shape, lambda i: (0, 0), pipeline_mode=pl.Buffered(1)),
            pl.BlockSpec(b.shape, lambda i: (0, 0), pipeline_mode=pl.Buffered(1)),
        ]

    flops = 2 * b_pad * sum(
        params[f"w{n}"].shape[0] * params[f"w{n}"].shape[1] for n in _LAYERS
    )
    bytes_accessed = (
        sum(int(a.size) * a.dtype.itemsize for a in args)
        + b_pad * cls_pad * 2  # bf16 output
    )
    cost = pl.CostEstimate(
        flops=flops,
        transcendentals=b_pad * (cls_pad + 1),  # exp row + divide
        bytes_accessed=bytes_accessed,
    )

    out = pl.pallas_call(
        _gesture_kernel,
        out_shape=jax.ShapeDtypeStruct((b_pad, cls_pad), jnp.bfloat16),
        grid=(num_tiles,),
        in_specs=in_specs,
        out_specs=pl.BlockSpec((tile_b, cls_pad), lambda i: (i, 0)),
        compiler_params=pltpu.CompilerParams(
            dimension_semantics=("parallel",),   # v7x: both TCs split the batch
            vmem_limit_bytes=32 * 1024 * 1024,   # headroom for 512-row tiles on v5e
        ),
        cost_estimate=cost,
    )(*args)

    return out[:batch, :num_classes].astype(jnp.float32)


def _prepare_params(raw, in_pad=_IN_PAD, cls_pad=_CLS_PAD):
    """Pad fc1's contraction dim and the classifier width; cast weights to bf16."""
    p = {}
    w1 = raw["w1"]
    p["w1"] = jnp.pad(w1, ((0, in_pad - w1.shape[0]), (0, 0))).astype(jnp.bfloat16)
    p["b1"] = raw["b1"].astype(jnp.float32)
    for name in ["2", "3", "4", "5"]:
        p[f"w{name}"] = raw[f"w{name}"].astype(jnp.bfloat16)
        p[f"b{name}"] = raw[f"b{name}"].astype(jnp.float32)
    wc, bc = raw["wc"], raw["bc"]
    nc = wc.shape[1]
    p["wc"] = jnp.pad(wc, ((0, 0), (0, cls_pad - nc))).astype(jnp.bfloat16)
    p["bc"] = jnp.pad(
        bc, ((0, 0), (0, cls_pad - nc)), constant_values=_NEG
    ).astype(jnp.float32)
    return p


def init_params(key, in_features=63, num_classes=5):
    """PyTorch-Linear-style init: U(-1/sqrt(fan_in), 1/sqrt(fan_in)), then pad/cast."""
    dims = [in_features, 1024, 512, 256, 128, 64, num_classes]
    raw = {}
    for name, fan_in, fan_out in zip(_LAYERS, dims[:-1], dims[1:]):
        key, kw, kb = jax.random.split(key, 3)
        bound = 1.0 / jnp.sqrt(float(fan_in))
        raw[f"w{name}"] = jax.random.uniform(
            kw, (fan_in, fan_out), jnp.float32, -bound, bound
        )
        raw[f"b{name}"] = jax.random.uniform(
            kb, (1, fan_out), jnp.float32, -bound, bound
        )
    return _prepare_params(raw)


def _reference_forward(x, params, num_classes=5):
    """Plain-JAX reference mirroring the kernel's bf16-weight arithmetic."""
    in_pad = params["w1"].shape[0]
    x_p = jnp.pad(x.astype(jnp.bfloat16), ((0, 0), (0, in_pad - x.shape[1])))
    h = x_p
    for name in ["1", "2", "3", "4", "5"]:
        y = jnp.dot(h, params[f"w{name}"], preferred_element_type=jnp.float32)
        h = jnp.maximum(y + params[f"b{name}"], 0.0).astype(jnp.bfloat16)
    logits = jnp.dot(h, params["wc"], preferred_element_type=jnp.float32)
    logits = logits + params["bc"]
    probs = jax.nn.softmax(logits, axis=1)
    return probs[:, :num_classes].astype(jnp.float32)


if __name__ == "__main__":
    key = jax.random.PRNGKey(0)
    key, kx = jax.random.split(key)

    batch, in_features, num_classes = 8, 63, 5
    x = jax.random.normal(kx, (batch, in_features), dtype=jnp.float32)
    params = init_params(key, in_features=in_features, num_classes=num_classes)

    out = gesture_net_forward(x, params, num_classes=num_classes)
    out = jax.block_until_ready(out)

    ref = _reference_forward(x, params, num_classes=num_classes)
    assert out.shape == (batch, num_classes)
    assert jnp.allclose(out, ref, atol=1e-2, rtol=5e-2), "mismatch vs reference"
    assert jnp.allclose(jnp.sum(out, axis=1), 1.0, atol=8e-3), "softmax rows must sum to ~1"

    print("KERNEL_OK")
</pallas_src>

<mosaic_0001>
module attributes {stable_mosaic.version = 11 : i64} {
  func.func @_gesture_kernel(%arg0: i32, %arg1: memref<16x64xbf16, #tpu.memory_space<vmem>>, %arg2: memref<64x1024xbf16, #tpu.memory_space<vmem>>, %arg3: memref<1x1024xf32, #tpu.memory_space<vmem>>, %arg4: memref<1024x512xbf16, #tpu.memory_space<vmem>>, %arg5: memref<1x512xf32, #tpu.memory_space<vmem>>, %arg6: memref<512x256xbf16, #tpu.memory_space<vmem>>, %arg7: memref<1x256xf32, #tpu.memory_space<vmem>>, %arg8: memref<256x128xbf16, #tpu.memory_space<vmem>>, %arg9: memref<1x128xf32, #tpu.memory_space<vmem>>, %arg10: memref<128x64xbf16, #tpu.memory_space<vmem>>, %arg11: memref<1x64xf32, #tpu.memory_space<vmem>>, %arg12: memref<64x128xbf16, #tpu.memory_space<vmem>>, %arg13: memref<1x128xf32, #tpu.memory_space<vmem>>, %arg14: memref<16x128xbf16, #tpu.memory_space<vmem>>) attributes {dimension_semantics = [#tpu.dimension_semantics<parallel>], iteration_bounds = array<i64: 1>, scalar_prefetch = 0 : i64, scratch_operands = 0 : i64, tpu.core_type = #tpu.core_type<tc>, window_params = [{transform_indices = @transform_0, window_bounds = array<i64: 16, 64>}, {pipeline_mode = #tpu.pipeline_mode<synchronous>, transform_indices = @transform_1, window_bounds = array<i64: 64, 1024>}, {pipeline_mode = #tpu.pipeline_mode<synchronous>, transform_indices = @transform_2, window_bounds = array<i64: 1, 1024>}, {pipeline_mode = #tpu.pipeline_mode<synchronous>, transform_indices = @transform_3, window_bounds = array<i64: 1024, 512>}, {pipeline_mode = #tpu.pipeline_mode<synchronous>, transform_indices = @transform_4, window_bounds = array<i64: 1, 512>}, {pipeline_mode = #tpu.pipeline_mode<synchronous>, transform_indices = @transform_5, window_bounds = array<i64: 512, 256>}, {pipeline_mode = #tpu.pipeline_mode<synchronous>, transform_indices = @transform_6, window_bounds = array<i64: 1, 256>}, {pipeline_mode = #tpu.pipeline_mode<synchronous>, transform_indices = @transform_7, window_bounds = array<i64: 256, 128>}, {pipeline_mode = #tpu.pipeline_mode<synchronous>, transform_indices = @transform_8, window_bounds = array<i64: 1, 128>}, {pipeline_mode = #tpu.pipeline_mode<synchronous>, transform_indices = @transform_9, window_bounds = array<i64: 128, 64>}, {pipeline_mode = #tpu.pipeline_mode<synchronous>, transform_indices = @transform_10, window_bounds = array<i64: 1, 64>}, {pipeline_mode = #tpu.pipeline_mode<synchronous>, transform_indices = @transform_11, window_bounds = array<i64: 64, 128>}, {pipeline_mode = #tpu.pipeline_mode<synchronous>, transform_indices = @transform_12, window_bounds = array<i64: 1, 128>}, {transform_indices = @transform_13, window_bounds = array<i64: 16, 128>}]} {
    %c0 = arith.constant 0 : index
    %c0_0 = arith.constant 0 : index
    %0 = vector.load %arg1[%c0, %c0_0] : memref<16x64xbf16, #tpu.memory_space<vmem>>, vector<16x64xbf16>
    %c0_1 = arith.constant 0 : index
    %c0_2 = arith.constant 0 : index
    %1 = vector.load %arg2[%c0_1, %c0_2] : memref<64x1024xbf16, #tpu.memory_space<vmem>>, vector<64x1024xbf16>
    %cst = arith.constant dense<0.000000e+00> : vector<16x1024xf32>
    %2 = tpu.matmul %0, %1, %cst {dimension_numbers = #tpu.dot_dimension_numbers<[1], [0], [0], [1], [0, 0, 1, 1], [], []>} : vector<16x64xbf16>, vector<64x1024xbf16>, vector<16x1024xf32> -> vector<16x1024xf32>
    %c0_3 = arith.constant 0 : index
    %c0_4 = arith.constant 0 : index
    %3 = vector.load %arg3[%c0_3, %c0_4] : memref<1x1024xf32, #tpu.memory_space<vmem>>, vector<1x1024xf32>
    %4 = vector.broadcast %3 : vector<1x1024xf32> to vector<16x1024xf32>
    %5 = arith.addf %2, %4 : vector<16x1024xf32>
    %cst_5 = arith.constant 0.000000e+00 : f32
    %6 = vector.broadcast %cst_5 : f32 to vector<16x1024xf32>
    %7 = arith.maximumf %5, %6 : vector<16x1024xf32>
    %8 = arith.truncf %7 : vector<16x1024xf32> to vector<16x1024xbf16>
    %c0_6 = arith.constant 0 : index
    %c0_7 = arith.constant 0 : index
    %9 = vector.load %arg4[%c0_6, %c0_7] : memref<1024x512xbf16, #tpu.memory_space<vmem>>, vector<1024x512xbf16>
    %cst_8 = arith.constant dense<0.000000e+00> : vector<16x512xf32>
    %10 = tpu.matmul %8, %9, %cst_8 {dimension_numbers = #tpu.dot_dimension_numbers<[1], [0], [0], [1], [0, 0, 1, 1], [], []>} : vector<16x1024xbf16>, vector<1024x512xbf16>, vector<16x512xf32> -> vector<16x512xf32>
    %c0_9 = arith.constant 0 : index
    %c0_10 = arith.constant 0 : index
    %11 = vector.load %arg5[%c0_9, %c0_10] : memref<1x512xf32, #tpu.memory_space<vmem>>, vector<1x512xf32>
    %12 = vector.broadcast %11 : vector<1x512xf32> to vector<16x512xf32>
    %13 = arith.addf %10, %12 : vector<16x512xf32>
    %cst_11 = arith.constant 0.000000e+00 : f32
    %14 = vector.broadcast %cst_11 : f32 to vector<16x512xf32>
    %15 = arith.maximumf %13, %14 : vector<16x512xf32>
    %16 = arith.truncf %15 : vector<16x512xf32> to vector<16x512xbf16>
    %c0_12 = arith.constant 0 : index
    %c0_13 = arith.constant 0 : index
    %17 = vector.load %arg6[%c0_12, %c0_13] : memref<512x256xbf16, #tpu.memory_space<vmem>>, vector<512x256xbf16>
    %cst_14 = arith.constant dense<0.000000e+00> : vector<16x256xf32>
    %18 = tpu.matmul %16, %17, %cst_14 {dimension_numbers = #tpu.dot_dimension_numbers<[1], [0], [0], [1], [0, 0, 1, 1], [], []>} : vector<16x512xbf16>, vector<512x256xbf16>, vector<16x256xf32> -> vector<16x256xf32>
    %c0_15 = arith.constant 0 : index
    %c0_16 = arith.constant 0 : index
    %19 = vector.load %arg7[%c0_15, %c0_16] : memref<1x256xf32, #tpu.memory_space<vmem>>, vector<1x256xf32>
    %20 = vector.broadcast %19 : vector<1x256xf32> to vector<16x256xf32>
    %21 = arith.addf %18, %20 : vector<16x256xf32>
    %cst_17 = arith.constant 0.000000e+00 : f32
    %22 = vector.broadcast %cst_17 : f32 to vector<16x256xf32>
    %23 = arith.maximumf %21, %22 : vector<16x256xf32>
    %24 = arith.truncf %23 : vector<16x256xf32> to vector<16x256xbf16>
    %c0_18 = arith.constant 0 : index
    %c0_19 = arith.constant 0 : index
    %25 = vector.load %arg8[%c0_18, %c0_19] : memref<256x128xbf16, #tpu.memory_space<vmem>>, vector<256x128xbf16>
    %cst_20 = arith.constant dense<0.000000e+00> : vector<16x128xf32>
    %26 = tpu.matmul %24, %25, %cst_20 {dimension_numbers = #tpu.dot_dimension_numbers<[1], [0], [0], [1], [0, 0, 1, 1], [], []>} : vector<16x256xbf16>, vector<256x128xbf16>, vector<16x128xf32> -> vector<16x128xf32>
    %c0_21 = arith.constant 0 : index
    %c0_22 = arith.constant 0 : index
    %27 = vector.load %arg9[%c0_21, %c0_22] : memref<1x128xf32, #tpu.memory_space<vmem>>, vector<1x128xf32>
    %28 = vector.broadcast %27 : vector<1x128xf32> to vector<16x128xf32>
    %29 = arith.addf %26, %28 : vector<16x128xf32>
    %cst_23 = arith.constant 0.000000e+00 : f32
    %30 = vector.broadcast %cst_23 : f32 to vector<16x128xf32>
    %31 = arith.maximumf %29, %30 : vector<16x128xf32>
    %32 = arith.truncf %31 : vector<16x128xf32> to vector<16x128xbf16>
    %c0_24 = arith.constant 0 : index
    %c0_25 = arith.constant 0 : index
    %33 = vector.load %arg10[%c0_24, %c0_25] : memref<128x64xbf16, #tpu.memory_space<vmem>>, vector<128x64xbf16>
    %cst_26 = arith.constant dense<0.000000e+00> : vector<16x64xf32>
    %34 = tpu.matmul %32, %33, %cst_26 {dimension_numbers = #tpu.dot_dimension_numbers<[1], [0], [0], [1], [0, 0, 1, 1], [], []>} : vector<16x128xbf16>, vector<128x64xbf16>, vector<16x64xf32> -> vector<16x64xf32>
    %c0_27 = arith.constant 0 : index
    %c0_28 = arith.constant 0 : index
    %35 = vector.load %arg11[%c0_27, %c0_28] : memref<1x64xf32, #tpu.memory_space<vmem>>, vector<1x64xf32>
    %36 = vector.broadcast %35 : vector<1x64xf32> to vector<16x64xf32>
    %37 = arith.addf %34, %36 : vector<16x64xf32>
    %cst_29 = arith.constant 0.000000e+00 : f32
    %38 = vector.broadcast %cst_29 : f32 to vector<16x64xf32>
    %39 = arith.maximumf %37, %38 : vector<16x64xf32>
    %40 = arith.truncf %39 : vector<16x64xf32> to vector<16x64xbf16>
    %c0_30 = arith.constant 0 : index
    %c0_31 = arith.constant 0 : index
    %41 = vector.load %arg12[%c0_30, %c0_31] : memref<64x128xbf16, #tpu.memory_space<vmem>>, vector<64x128xbf16>
    %cst_32 = arith.constant dense<0.000000e+00> : vector<16x128xf32>
    %42 = tpu.matmul %40, %41, %cst_32 {dimension_numbers = #tpu.dot_dimension_numbers<[1], [0], [0], [1], [0, 0, 1, 1], [], []>} : vector<16x64xbf16>, vector<64x128xbf16>, vector<16x128xf32> -> vector<16x128xf32>
    %c0_33 = arith.constant 0 : index
    %c0_34 = arith.constant 0 : index
    %43 = vector.load %arg13[%c0_33, %c0_34] : memref<1x128xf32, #tpu.memory_space<vmem>>, vector<1x128xf32>
    %44 = vector.broadcast %43 : vector<1x128xf32> to vector<16x128xf32>
    %45 = arith.addf %42, %44 : vector<16x128xf32>
    %cst_35 = arith.constant dense<0xFF800000> : vector<16xf32>
    %46 = vector.multi_reduction <maximumf>, %45, %cst_35 [1] : vector<16x128xf32> to vector<16xf32>
    %47 = vector.shape_cast %46 : vector<16xf32> to vector<16x1xf32>
    %48 = vector.broadcast %47 : vector<16x1xf32> to vector<16x128xf32>
    %49 = arith.subf %45, %48 : vector<16x128xf32>
    %50 = math.exp %49 : vector<16x128xf32>
    %cst_36 = arith.constant dense<0.000000e+00> : vector<16xf32>
    %51 = vector.multi_reduction <add>, %50, %cst_36 [1] : vector<16x128xf32> to vector<16xf32>
    %52 = vector.shape_cast %51 : vector<16xf32> to vector<16x1xf32>
    %53 = vector.broadcast %52 : vector<16x1xf32> to vector<16x128xf32>
    %54 = arith.divf %50, %53 : vector<16x128xf32>
    %55 = arith.truncf %54 : vector<16x128xf32> to vector<16x128xbf16>
    %c0_37 = arith.constant 0 : index
    %c0_38 = arith.constant 0 : index
    %56 = vector.load %arg14[%c0_37, %c0_38] : memref<16x128xbf16, #tpu.memory_space<vmem>>, vector<16x128xbf16>
    tpu.vector_store %arg14[%c0_37, %c0_38], %55 {strides = array<i32>} : memref<16x128xbf16, #tpu.memory_space<vmem>>, vector<16x128xbf16>,
    return
  }
  func.func @transform_0(%arg0: i32) -> (i32, i32) {
    %c0_i32 = arith.constant 0 : i32
    %c0_i32_0 = arith.constant 0 : i32
    return %arg0, %c0_i32 : i32, i32
  }
  func.func @transform_1(%arg0: i32) -> (i32, i32) {
    %c0_i32 = arith.constant 0 : i32
    %c0_i32_0 = arith.constant 0 : i32
    %c0_i32_1 = arith.constant 0 : i32
    return %c0_i32, %c0_i32_0 : i32, i32
  }
  func.func @transform_2(%arg0: i32) -> (i32, i32) {
    %c0_i32 = arith.constant 0 : i32
    %c0_i32_0 = arith.constant 0 : i32
    %c0_i32_1 = arith.constant 0 : i32
    return %c0_i32, %c0_i32_0 : i32, i32
  }
  func.func @transform_3(%arg0: i32) -> (i32, i32) {
    %c0_i32 = arith.constant 0 : i32
    %c0_i32_0 = arith.constant 0 : i32
    %c0_i32_1 = arith.constant 0 : i32
    return %c0_i32, %c0_i32_0 : i32, i32
  }
  func.func @transform_4(%arg0: i32) -> (i32, i32) {
    %c0_i32 = arith.constant 0 : i32
    %c0_i32_0 = arith.constant 0 : i32
    %c0_i32_1 = arith.constant 0 : i32
    return %c0_i32, %c0_i32_0 : i32, i32
  }
  func.func @transform_5(%arg0: i32) -> (i32, i32) {
    %c0_i32 = arith.constant 0 : i32
    %c0_i32_0 = arith.constant 0 : i32
    %c0_i32_1 = arith.constant 0 : i32
    return %c0_i32, %c0_i32_0 : i32, i32
  }
  func.func @transform_6(%arg0: i32) -> (i32, i32) {
    %c0_i32 = arith.constant 0 : i32
    %c0_i32_0 = arith.constant 0 : i32
    %c0_i32_1 = arith.constant 0 : i32
    return %c0_i32, %c0_i32_0 : i32, i32
  }
  func.func @transform_7(%arg0: i32) -> (i32, i32) {
    %c0_i32 = arith.constant 0 : i32
    %c0_i32_0 = arith.constant 0 : i32
    %c0_i32_1 = arith.constant 0 : i32
    return %c0_i32, %c0_i32_0 : i32, i32
  }
  func.func @transform_8(%arg0: i32) -> (i32, i32) {
    %c0_i32 = arith.constant 0 : i32
    %c0_i32_0 = arith.constant 0 : i32
    %c0_i32_1 = arith.constant 0 : i32
    return %c0_i32, %c0_i32_0 : i32, i32
  }
  func.func @transform_9(%arg0: i32) -> (i32, i32) {
    %c0_i32 = arith.constant 0 : i32
    %c0_i32_0 = arith.constant 0 : i32
    %c0_i32_1 = arith.constant 0 : i32
    return %c0_i32, %c0_i32_0 : i32, i32
  }
  func.func @transform_10(%arg0: i32) -> (i32, i32) {
    %c0_i32 = arith.constant 0 : i32
    %c0_i32_0 = arith.constant 0 : i32
    %c0_i32_1 = arith.constant 0 : i32
    return %c0_i32, %c0_i32_0 : i32, i32
  }
  func.func @transform_11(%arg0: i32) -> (i32, i32) {
    %c0_i32 = arith.constant 0 : i32
    %c0_i32_0 = arith.constant 0 : i32
    %c0_i32_1 = arith.constant 0 : i32
    return %c0_i32, %c0_i32_0 : i32, i32
  }
  func.func @transform_12(%arg0: i32) -> (i32, i32) {
    %c0_i32 = arith.constant 0 : i32
    %c0_i32_0 = arith.constant 0 : i32
    %c0_i32_1 = arith.constant 0 : i32
    return %c0_i32, %c0_i32_0 : i32, i32
  }
  func.func @transform_13(%arg0: i32) -> (i32, i32) {
    %c0_i32 = arith.constant 0 : i32
    %c0_i32_0 = arith.constant 0 : i32
    return %arg0, %c0_i32 : i32, i32
  }
}

</mosaic_0001>

<bundles_post_ra>
// kernel: gesture_net_forward.1
= control target key start
LH: loop header
LB: loop body
LE: loop exit
PB: predicated region body
PF: predicated region fallthrough
CT: control target
= control target key end

     0   :  { %18 = vsyncpa [#allocation3], 0  ;;  %s5002_s0 = inlined_call_operand.vmem [shape: bf16[16,64], index: 0, kind: input, shape index: {}]   ;;  %s5003_s1 = inlined_call_operand.hbm [shape: bf16[64,1024], index: 1, kind: input, shape index: {}]   ;;  %s5004_s2 = inlined_call_operand.hbm [shape: f32[1,1024], index: 2, kind: input, shape index: {}]   ;;  %s5005_s3 = inlined_call_operand.hbm [shape: bf16[1024,512], index: 3, kind: input, shape index: {}]   ;;  %s5006_s4 = inlined_call_operand.hbm [shape: f32[1,512], index: 4, kind: input, shape index: {}]   ;;  %s5007_s5 = inlined_call_operand.hbm [shape: bf16[512,256], index: 5, kind: input, shape index: {}]   ;;  %s5008_s6 = inlined_call_operand.vmem [shape: f32[1,256], index: 6, kind: input, shape index: {}]   ;;  %s5009_s7 = inlined_call_operand.vmem [shape: bf16[256,128], index: 7, kind: input, shape index: {}]   ;;  %s5010_s8 = inlined_call_operand.hbm [shape: f32[1,128], index: 8, kind: input, shape index: {}]   ;;  %s5011_s9 = inlined_call_operand.vmem [shape: bf16[128,64], index: 9, kind: input, shape index: {}]   ;;  %s5012_s10 = inlined_call_operand.hbm [shape: f32[1,64], index: 10, kind: input, shape index: {}]   ;;  %s5013_s11 = inlined_call_operand.vmem [shape: bf16[64,128], index: 11, kind: input, shape index: {}]   ;;  %s5014_s12 = inlined_call_operand.hbm [shape: f32[1,128], index: 12, kind: input, shape index: {}]   ;;  %s5015_s13 = inlined_call_operand.vmem [shape: bf16[16,128], index: 13, kind: output, shape index: {}]  }
   0x1   :  { %19 = vsyncpa [#allocation5], 0 }
   0x2   :  { %20 = vsyncpa [#allocation8], 0 }
   0x3   :  { %21 = vsyncpa [#allocation11], 0 }
   0x4   :  { %22 = vsyncpa [#allocation14], 0  ;;  %s4627_s25 = smov [#allocation4]   ;;  %s4628_s27 = smov [#allocation7]  }
   0x5   :  { %s43_s26 = sshll.u32 %s4627_s25, 4  ;;  %s65_s28 = sshll.u32 %s4628_s27, 4  ;;  %s44_s26 = int_to_ptr.vmem [resolvable:$true] %s43_s26  ;;  %s66_s28 = int_to_ptr.vmem [resolvable:$true] %s65_s28 }
   0x6   :  { %s4441_s14 = scalar_lea.hbm %s5004_s2, 128 }
   0x7   :  { %p4442_p0 = scmp.ne.s32.totalorder %s5004_s2, %s4441_s14  ;;  %p4445_p1 = scmp.lt.u32.totalorder %s4441_s14, %s5004_s2 }
   0x9   :  { %p4447_p2 = pnand %p4445_p1, %p4442_p0 }
   0xb   :  { %4450 = shalt.err (!%p4447_p2)
}
   0xc   :  { %s4451_s19 = scalar_lea.vmem %s44_s26, 128  ;;  %p4456_p4 = scmp.lt.s32.totalorder %s44_s26, %s44_s26 }
   0xd   :  { %p4452_p3 = scmp.ne.s32.totalorder %s44_s26, %s4451_s19  ;;  %p4457_p5 = scmp.lt.s32.totalorder %s4451_s19, %s4451_s19 }
   0xf   :  { %p4458_p6 = por %p4457_p5, %p4456_p4 }
  0x11   :  { %p4459_p7 = pnand %p4458_p6, %p4452_p3 }
  0x13   :  { %4462 = shalt.err (!%p4459_p7)
}
  0x14   :  { %46 = dma.hbm_to_vmem [thread:$0]  %s5004_s2, 128, %s44_s26, [#allocation5]  }
  0x15   :  { %s4463_s24 = scalar_lea.hbm %s5006_s4, 64 }
  0x16   :  { %p4464_p8 = scmp.ne.s32.totalorder %s5006_s4, %s4463_s24  ;;  %p4467_p9 = scmp.lt.u32.totalorder %s4463_s24, %s5006_s4 }
  0x18   :  { %p4469_p10 = pnand %p4467_p9, %p4464_p8 }
  0x1a   :  { %4472 = shalt.err (!%p4469_p10)
}
  0x1b   :  { %s4473_s14 = scalar_lea.vmem %s66_s28, 64  ;;  %p4478_p12 = scmp.lt.s32.totalorder %s66_s28, %s66_s28 }
  0x1c   :  { %p4474_p11 = scmp.ne.s32.totalorder %s66_s28, %s4473_s14  ;;  %p4479_p13 = scmp.lt.s32.totalorder %s4473_s14, %s4473_s14 }
  0x1e   :  { %p4480_p0 = por %p4479_p13, %p4478_p12 }
  0x20   :  { %p4481_p1 = pnand %p4480_p0, %p4474_p11 }
  0x22   :  { %4484 = shalt.err (!%p4481_p1)
}
  0x23   :  { %68 = dma.hbm_to_vmem [thread:$0]  %s5006_s4, 64, %s66_s28, [#allocation8]  }
  0x24   :  { %s4629_s15 = smov [#allocation10]   ;;  %s4630_s17 = smov [#allocation2]  }
  0x25   :  { %s91_s16 = sshll.u32 %s4629_s15, 4  ;;  %s30_s18 = sshll.u32 %s4630_s17, 4  ;;  %s92_s16 = int_to_ptr.vmem [resolvable:$true] %s91_s16  ;;  %s4738_s18 = int_to_ptr.vmem [resolvable:$true] %s30_s18 }
  0x26   :  { %s4485_s21 = scalar_lea.hbm %s5010_s8, 16 }
  0x27   :  { %p4486_p2 = scmp.ne.s32.totalorder %s5010_s8, %s4485_s21  ;;  %p4489_p3 = scmp.lt.u32.totalorder %s4485_s21, %s5010_s8 }
  0x29   :  { %p4491_p4 = pnand %p4489_p3, %p4486_p2 }
  0x2b   :  { %4494 = shalt.err (!%p4491_p4)
}
  0x2c   :  { %s4495_s4 = scalar_lea.vmem %s92_s16, 16  ;;  %s4499_s28 = scalar_lea.vmem %s92_s16, 32 }
  0x2d   :  { %p4496_p5 = scmp.ne.s32.totalorder %s92_s16, %s4495_s4  ;;  %p4500_p6 = scmp.lt.s32.totalorder %s92_s16, %s92_s16 }
  0x2e   :  { %p4501_p7 = scmp.lt.s32.totalorder %s4499_s28, %s4495_s4 }
  0x30   :  { %p4502_p8 = por %p4501_p7, %p4500_p6 }
  0x32   :  { %p4503_p9 = pnand %p4502_p8, %p4496_p5 }
  0x34   :  { %4506 = shalt.err (!%p4503_p9)
}
  0x35   :  { %94 = dma.hbm_to_vmem [thread:$0]  %s5010_s8, 16, %s92_s16, [#allocation11]  }
  0x36   :  { %s4507_s2 = scalar_lea.hbm %s5003_s1, 4096 }
  0x37   :  { %p4508_p10 = scmp.ne.s32.totalorder %s5003_s1, %s4507_s2  ;;  %p4511_p11 = scmp.lt.u32.totalorder %s4507_s2, %s5003_s1 }
  0x39   :  { %p4513_p12 = pnand %p4511_p11, %p4508_p10 }
  0x3b   :  { %4516 = shalt.err (!%p4513_p12)
}
  0x3c   :  { %s4517_s20 = scalar_lea.vmem %s4738_s18, 4096  ;;  %p4522_p0 = scmp.lt.s32.totalorder %s4738_s18, %s4738_s18 }
  0x3d   :  { %p4518_p13 = scmp.ne.s32.totalorder %s4738_s18, %s4517_s20  ;;  %p4523_p1 = scmp.lt.s32.totalorder %s4517_s20, %s4517_s20 }
  0x3f   :  { %p4524_p2 = por %p4523_p1, %p4522_p0 }
  0x41   :  { %p4525_p3 = pnand %p4524_p2, %p4518_p13 }
  0x43   :  { %4528 = shalt.err (!%p4525_p3)
}
  0x44   :  { %s4631_s8 = smov 512   ;;  %s4632_s16 = smov 32  }
  0x45   :  { %36 = dma.hbm_to_vmem [thread:$0]  %s5003_s1, 4096, %s4738_s18, [#allocation3], %s4631_s8, %s4631_s8, %s4632_s16  }
  0x46   :  { %s4633_s23 = smov [#allocation6]   ;;  %s4529_s28 = scalar_lea.hbm %s5005_s3, 32768 }
  0x47   :  { %s52_s24 = sshll.u32 %s4633_s23, 4  ;;  %p4530_p4 = scmp.ne.s32.totalorder %s5005_s3, %s4529_s28  ;;  %s53_s24 = int_to_ptr.vmem [resolvable:$true] %s52_s24 }
  0x48   :  { %p4533_p5 = scmp.lt.u32.totalorder %s4529_s28, %s5005_s3 }
  0x4a   :  { %p4535_p6 = pnand %p4533_p5, %p4530_p4 }
  0x4c   :  { %4538 = shalt.err (!%p4535_p6)
}
  0x4d   :  { %s4539_s2 = scalar_lea.vmem %s53_s24, 32768  ;;  %p4544_p8 = scmp.lt.s32.totalorder %s53_s24, %s53_s24 }
  0x4e   :  { %p4540_p7 = scmp.ne.s32.totalorder %s53_s24, %s4539_s2  ;;  %p4545_p9 = scmp.lt.s32.totalorder %s4539_s2, %s4539_s2 }
  0x50   :  { %p4546_p10 = por %p4545_p9, %p4544_p8 }
  0x52   :  { %p4547_p11 = pnand %p4546_p10, %p4540_p7 }
  0x54   :  { %4550 = shalt.err (!%p4547_p11)
}
  0x55   :  { %s4634_s1 = smov 256   ;;  %s4635_s18 = smov 16  }
  0x56   :  { %58 = dma.hbm_to_vmem [thread:$0]  %s5005_s3, 32768, %s53_s24, [#allocation5], %s4634_s1, %s4634_s1, %s4635_s18  }
  0x57   :  { %s4636_s17 = smov [#allocation9]   ;;  %s4551_s16 = scalar_lea.hbm %s5007_s5, 8192 }
  0x58   :  { %s74_s19 = sshll.u32 %s4636_s17, 4  ;;  %p4552_p12 = scmp.ne.s32.totalorder %s5007_s5, %s4551_s16  ;;  %s75_s19 = int_to_ptr.vmem [resolvable:$true] %s74_s19 }
  0x59   :  { %p4555_p13 = scmp.lt.u32.totalorder %s4551_s16, %s5007_s5 }
  0x5b   :  { %p4557_p0 = pnand %p4555_p13, %p4552_p12 }
  0x5d   :  { %4560 = shalt.err (!%p4557_p0)
}
  0x5e   :  { %s4561_s4 = scalar_lea.vmem %s75_s19, 8192  ;;  %p4566_p2 = scmp.lt.s32.totalorder %s75_s19, %s75_s19 }
  0x5f   :  { %p4562_p1 = scmp.ne.s32.totalorder %s75_s19, %s4561_s4  ;;  %p4567_p3 = scmp.lt.s32.totalorder %s4561_s4, %s4561_s4 }
  0x61   :  { %p4568_p4 = por %p4567_p3, %p4566_p2 }
  0x63   :  { %p4569_p5 = pnand %p4568_p4, %p4562_p1 }
  0x65   :  { %4572 = shalt.err (!%p4569_p5)
}
  0x66   :  { %s4637_s3 = smov 128   ;;  %s4638_s24 = smov 8  }
  0x67   :  { %80 = dma.hbm_to_vmem [thread:$0]  %s5007_s5, 8192, %s75_s19, [#allocation8], %s4637_s3, %s4637_s3, %s4638_s24  }
  0x68   :  { %s4639_s29 = smov [#allocation12]   ;;  %s4640_s14 = smov [#allocation13]  }
  0x69   :  { %s103_s30 = sshll.u32 %s4639_s29, 4  ;;  %s115_s2 = sshll.u32 %s4640_s14, 4  ;;  %s104_s30 = int_to_ptr.vmem [resolvable:$true] %s103_s30  ;;  %s116_s2 = int_to_ptr.vmem [resolvable:$true] %s115_s2 }
  0x6a   :  { %s4573_s26 = scalar_lea.hbm %s5012_s10, 16 }
  0x6b   :  { %p4574_p6 = scmp.ne.s32.totalorder %s5012_s10, %s4573_s26  ;;  %p4577_p7 = scmp.lt.u32.totalorder %s4573_s26, %s5012_s10 }
  0x6d   :  { %p4579_p8 = pnand %p4577_p7, %p4574_p6 }
  0x6f   :  { %4582 = shalt.err (!%p4579_p8)
}
  0x70   :  { %s4583_s5 = scalar_lea.vmem %s104_s30, 16  ;;  %s4587_s19 = scalar_lea.vmem %s104_s30, 32 }
  0x71   :  { %p4584_p9 = scmp.ne.s32.totalorder %s104_s30, %s4583_s5  ;;  %p4588_p10 = scmp.lt.s32.totalorder %s104_s30, %s104_s30 }
  0x72   :  { %p4589_p11 = scmp.lt.s32.totalorder %s4587_s19, %s4583_s5 }
  0x74   :  { %p4590_p12 = por %p4589_p11, %p4588_p10 }
  0x76   :  { %p4591_p13 = pnand %p4590_p12, %p4584_p9 }
  0x78   :  { %4594 = shalt.err (!%p4591_p13)
}
  0x79   :  { %106 = dma.hbm_to_vmem [thread:$0]  %s5012_s10, 16, %s104_s30, [#allocation11]  }
  0x7a   :  { %s4595_s25 = scalar_lea.hbm %s5014_s12, 16 }
  0x7b   :  { %p4596_p0 = scmp.ne.s32.totalorder %s5014_s12, %s4595_s25  ;;  %p4599_p1 = scmp.lt.u32.totalorder %s4595_s25, %s5014_s12 }
  0x7d   :  { %p4601_p2 = pnand %p4599_p1, %p4596_p0 }
  0x7f   :  { %4604 = shalt.err (!%p4601_p2)
}
  0x80   :  { %s4605_s27 = scalar_lea.vmem %s116_s2, 16  ;;  %s4609_s29 = scalar_lea.vmem %s116_s2, 32 }
  0x81   :  { %p4606_p3 = scmp.ne.s32.totalorder %s116_s2, %s4605_s27  ;;  %p4610_p4 = scmp.lt.s32.totalorder %s116_s2, %s116_s2 }
  0x82   :  { %p4611_p5 = scmp.lt.s32.totalorder %s4609_s29, %s4605_s27 }
  0x84   :  { %p4612_p6 = por %p4611_p5, %p4610_p4 }
  0x86   :  { %p4613_p7 = pnand %p4612_p6, %p4606_p3 }
  0x88   :  { %4616 = shalt.err (!%p4613_p7)
}
  0x89   :  { %118 = dma.hbm_to_vmem [thread:$0]  %s5014_s12, 16, %s116_s2, [#allocation14]  }
  0x8a   :  { %4617 = dma.done.wait [#allocation3], 4096  }
  0x8b   :  { %4618 = vsyncadd [#allocation3], 4294963200 }
  0x8c   :  { %4619 = dma.done.wait [#allocation5], 32896  }
  0x8d   :  { %4620 = vsyncadd [#allocation5], 4294934400 }
  0x8e   :  { %4621 = dma.done.wait [#allocation8], 8256  }
  0x8f   :  { %4622 = vsyncadd [#allocation8], 4294959040 }
  0x90   :  { %4623 = dma.done.wait [#allocation11], 32  }
  0x91   :  { %4624 = vsyncadd [#allocation11], 4294967264 }
  0x92   :  { %4625 = dma.done.wait [#allocation14], 16  }
  0x93   :  { %4626 = vsyncadd [#allocation14], 4294967280  ;;  %v4641_v0 = vmov 0   ;;  %v146_v1 = vld [vmem:[#allocation2] sm:$0xff]  ;;  %v148_v14 = vld [vmem:[#allocation2 + $0x10] sm:$0xff]  ;;  %vm385_vm0 = vcmask 523264  }
  0x94   :  { %421 = vmatprep.mubr.bf16.mxu1 %v4641_v0  ;;  %507 = vmatprep.mubr.bf16.mxu0 %v4641_v0  ;;  %v150_v2 = vld [vmem:[#allocation2 + $0x20] sm:$0xff]  ;;  %v152_v15 = vld [vmem:[#allocation2 + $0x30] sm:$0xff]  ;;  %v147_v25 = vld [vmem:[#allocation2 + $0x8] sm:$0xff]  ;;  %vm4643_vm1 = vmmov 0  }
  0x95   :  { %v154_v3 = vld [vmem:[#allocation2 + $0x40] sm:$0xff]  ;;  %v3403_v4 = vcombine.high %v146_v1, %v150_v2  ;;  %v3402_v5 = vcombine.low %v146_v1, %v150_v2  ;;  %v3407_v16 = vcombine.high %v148_v14, %v152_v15  ;;  %v3406_v17 = vcombine.low %v148_v14, %v152_v15  ;;  %v156_v18 = vld [vmem:[#allocation2 + $0x50] sm:$0xff]  ;;  %v151_v26 = vld [vmem:[#allocation2 + $0x28] sm:$0xff] }
  0x96   :  { %v158_v6 = vld [vmem:[#allocation2 + $0x60] sm:$0xff]  ;;  %v160_v19 = vld [vmem:[#allocation2 + $0x70] sm:$0xff]  ;;  %v3405_v32 = vcombine.high %v147_v25, %v151_v26  ;;  %v155_v33 = vld [vmem:[#allocation2 + $0x48] sm:$0xff]  ;;  %v3404_v38 = vcombine.low %v147_v25, %v151_v26 }
  0x97   :  { %v3411_v7 = vcombine.high %v154_v3, %v158_v6  ;;  %v162_v8 = vld [vmem:[#allocation2 + $0x80] sm:$0xff]  ;;  %389 = vmatprep.subr.bf16.mxu1 %v3403_v4  ;;  %v3410_v10 = vcombine.low %v154_v3, %v158_v6  ;;  %v3415_v21 = vcombine.high %v156_v18, %v160_v19  ;;  %v164_v22 = vld [vmem:[#allocation2 + $0x90] sm:$0xff]  ;;  %475 = vmatprep.subr.bf16.mxu0 %v3407_v16  ;;  %v159_v34 = vld [vmem:[#allocation2 + $0x68] sm:$0xff] }
  0x98   :  { %v166_v9 = vld [vmem:[#allocation2 + $0xa0] sm:$0xff]  ;;  %390 = vmatpush1.bf16.msra.mxu1 %v3402_v5  ;;  %v168_v23 = vld [vmem:[#allocation2 + $0xb0] sm:$0xff]  ;;  %476 = vmatpush1.bf16.msra.mxu0 %v3406_v17  ;;  %v3414_v27 = vcombine.low %v156_v18, %v160_v19  ;;  %v3413_v39 = vcombine.high %v155_v33, %v159_v34  ;;  %v163_v40 = vld [vmem:[#allocation2 + $0x88] sm:$0xff]  ;;  %v3412_v44 = vcombine.low %v155_v33, %v159_v34 }
  0x99   :  { %391 = vmatprep.subr.bf16.mxu1 %v3411_v7  ;;  %v3419_v11 = vcombine.high %v162_v8, %v166_v9  ;;  %v170_v12 = vld [vmem:[#allocation2 + $0xc0] sm:$0xff]  ;;  %v3418_v20 = vcombine.low %v162_v8, %v166_v9  ;;  %477 = vmatprep.subr.bf16.mxu0 %v3415_v21  ;;  %v3423_v28 = vcombine.high %v164_v22, %v168_v23  ;;  %v172_v30 = vld [vmem:[#allocation2 + $0xd0] sm:$0xff]  ;;  %v167_v41 = vld [vmem:[#allocation2 + $0xa8] sm:$0xff] }
  0x9a   :  { %v174_v13 = vld [vmem:[#allocation2 + $0xe0] sm:$0xff]  ;;  %v176_v31 = vld [vmem:[#allocation2 + $0xf0] sm:$0xff]  ;;  %v3422_v35 = vcombine.low %v164_v22, %v168_v23  ;;  %v3927_v43 = vld [vmem:[#allocation6 + $0x4] ss:$16 sps:$4 sm:$0xff]   ;;  %v3421_v46 = vcombine.high %v163_v40, %v167_v41  ;;  %v3420_v50 = vcombine.low %v163_v40, %v167_v41 }
  0x9b   :  { %v3427_v24 = vcombine.high %v170_v12, %v174_v13  ;;  %v3426_v29 = vcombine.low %v170_v12, %v174_v13  ;;  %v4822_v36 = vld [vmem:[%s5002_s0] sm:$0xff]   ;;  %v3431_v37 = vcombine.high %v172_v30, %v176_v31  ;;  %v3430_v42 = vcombine.low %v172_v30, %v176_v31  ;;  %v171_v45 = vld [vmem:[#allocation2 + $0xc8] sm:$0xff]  ;;  %v149_v51 = vld [vmem:[#allocation2 + $0x18] sm:$0xff] }
  0x9c   :  { %392 = vmatpush1.bf16.msra.mxu1 %v3410_v10  ;;  %478 = vmatpush1.bf16.msra.mxu0 %v3414_v27  ;;  %v175_v47 = vld [vmem:[#allocation2 + $0xe8] sm:$0xff]  ;;  %v153_v53 = vld [vmem:[#allocation2 + $0x38] sm:$0xff]  ;;  %v3930_v16 = vld [vmem:[#allocation6 + $0xc] ss:$16 sps:$4 sm:$0xff]  }
  0x9d   :  { %393 = vmatprep.subr.bf16.mxu1 %v3419_v11  ;;  %479 = vmatprep.subr.bf16.mxu0 %v3423_v28  ;;  %v3925_v48 = vld [vmem:[#allocation6] ss:$16 sps:$4 sm:$0xff]   ;;  %v3933_v49 = vld [vmem:[#allocation6 + $0x24] ss:$16 sps:$4 sm:$0xff]   ;;  %v3429_v52 = vcombine.high %v171_v45, %v175_v47  ;;  %v3428_v56 = vcombine.low %v171_v45, %v175_v47  ;;  %v3409_v58 = vcombine.high %v149_v51, %v153_v53  ;;  %v3928_v17 = vld [vmem:[#allocation6 + $0x8] ss:$16 sps:$4 sm:$0xff]  }
  0x9e   :  { %v3931_v54 = vld [vmem:[#allocation6 + $0x20] ss:$16 sps:$4 sm:$0xff]   ;;  %v3939_v55 = vld [vmem:[#allocation6 + $0x44] ss:$16 sps:$4 sm:$0xff]   ;;  %v3408_v62 = vcombine.low %v149_v51, %v153_v53  ;;  %v3936_v19 = vld [vmem:[#allocation6 + $0x2c] ss:$16 sps:$4 sm:$0xff]  }
  0x9f   :  { %v157_v57 = vld [vmem:[#allocation2 + $0x58] sm:$0xff]  ;;  %v3934_v22 = vld [vmem:[#allocation6 + $0x28] ss:$16 sps:$4 sm:$0xff]   ;;  %v3942_v23 = vld [vmem:[#allocation6 + $0x4c] ss:$16 sps:$4 sm:$0xff]  }
  0xa0   :  { %394 = vmatpush1.bf16.msra.mxu1 %v3418_v20  ;;  %480 = vmatpush1.bf16.msra.mxu0 %v3422_v35  ;;  %v161_v59 = vld [vmem:[#allocation2 + $0x78] sm:$0xff]  ;;  %v3940_v26 = vld [vmem:[#allocation6 + $0x48] ss:$16 sps:$4 sm:$0xff]   ;;  %v3948_v27 = vld [vmem:[#allocation6 + $0x6c] ss:$16 sps:$4 sm:$0xff]  }
  0xa1   :  { %395 = vmatprep.subr.bf16.mxu1 %v3427_v24  ;;  %481 = vmatprep.subr.bf16.mxu0 %v3431_v37  ;;  %v3937_v60 = vld [vmem:[#allocation6 + $0x40] ss:$16 sps:$4 sm:$0xff]   ;;  %v3945_v61 = vld [vmem:[#allocation6 + $0x64] ss:$16 sps:$4 sm:$0xff]   ;;  %v3417_v1 = vcombine.high %v157_v57, %v161_v59  ;;  %v3416_v5 = vcombine.low %v157_v57, %v161_v59  ;;  %v3946_v30 = vld [vmem:[#allocation6 + $0x68] ss:$16 sps:$4 sm:$0xff]  }
  0xa2   :  { %v165_v63 = vld [vmem:[#allocation2 + $0x98] sm:$0xff]  ;;  %v3954_v31 = vld [vmem:[#allocation6 + $0x8c] ss:$16 sps:$4 sm:$0xff]   ;;  %v3952_v34 = vld [vmem:[#allocation6 + $0x88] ss:$16 sps:$4 sm:$0xff]  }
  0xa3   :  { %v169_v2 = vld [vmem:[#allocation2 + $0xb8] sm:$0xff]  ;;  %v3960_v35 = vld [vmem:[#allocation6 + $0xac] ss:$16 sps:$4 sm:$0xff]   ;;  %v3970_v45 = vld [vmem:[#allocation6 + $0xe8] ss:$16 sps:$4 sm:$0xff]  }
  0xa4   :  { %396 = vmatpush1.bf16.msra.mxu1 %v3426_v29  ;;  %482 = vmatpush1.bf16.msra.mxu0 %v3430_v42  ;;  %v3943_v3 = vld [vmem:[#allocation6 + $0x60] ss:$16 sps:$4 sm:$0xff]   ;;  %v3951_v4 = vld [vmem:[#allocation6 + $0x84] ss:$16 sps:$4 sm:$0xff]   ;;  %v3425_v7 = vcombine.high %v165_v63, %v169_v2  ;;  %v3424_v11 = vcombine.low %v165_v63, %v169_v2  ;;  %v3964_v42 = vld [vmem:[#allocation6 + $0xc8] ss:$16 sps:$4 sm:$0xff]  }
  0xa5   :  { %432 = vmatprep.subr.bf16.mxu1 %v3405_v32  ;;  %2143 = vmatprep.subr.bf16.mxu0 %v3927_v43  ;;  %v173_v6 = vld [vmem:[#allocation2 + $0xd8] sm:$0xff]  ;;  %v3972_v43 = vld [vmem:[#allocation6 + $0xec] ss:$16 sps:$4 sm:$0xff]   ;;  %v3976_v47 = vld [vmem:[#allocation6 + $0x108] ss:$16 sps:$4 sm:$0xff]  }
  0xa6   :  { %v177_v8 = vld [vmem:[#allocation2 + $0xf8] sm:$0xff]  ;;  %v3988_v51 = vld [vmem:[#allocation6 + $0x148] ss:$16 sps:$4 sm:$0xff]   ;;  %v4014_v59 = vld [vmem:[#allocation6 + $0x1cc] ss:$16 sps:$4 sm:$0xff]  }
  0xa7   :  { %3434 = vmatmul.mubr.msk.bf16.vlgmr.msra.gmra.mrb[0].mxu1 %vm385_vm0, %v4822_v36  ;;  %3436 = vmatmul.mubr.msk.bf16.vlgmr.msra.gmra.mrb[0].mxu0 %vm385_vm0, %v4822_v36  ;;  %v3949_v9 = vld [vmem:[#allocation6 + $0x80] ss:$16 sps:$4 sm:$0xff]   ;;  %v3957_v10 = vld [vmem:[#allocation6 + $0xa4] ss:$16 sps:$4 sm:$0xff]   ;;  %v3433_v12 = vcombine.high %v173_v6, %v177_v8  ;;  %v3432_v15 = vcombine.low %v173_v6, %v177_v8  ;;  %v3994_v53 = vld [vmem:[#allocation6 + $0x168] ss:$16 sps:$4 sm:$0xff]  }
  0xa8   :  { %433 = vmatpush1.bf16.msra.mxu1 %v3404_v38  ;;  %464 = vmatprep.mubr.bf16.mxu1 %v4641_v0  ;;  %v3955_v13 = vld [vmem:[#allocation6 + $0xa0] ss:$16 sps:$4 sm:$0xff]   ;;  %v3963_v14 = vld [vmem:[#allocation6 + $0xc4] ss:$16 sps:$4 sm:$0xff]   ;;  %v3958_v38 = vld [vmem:[#allocation6 + $0xa8] ss:$16 sps:$4 sm:$0xff]  }
  0xa9   :  { %434 = vmatprep.subr.bf16.mxu1 %v3413_v39  ;;  %2144 = vmatpush1.bf16.msra.mxu0 %v3925_v48  ;;  %v3969_v18 = vld [vmem:[#allocation6 + $0xe4] ss:$16 sps:$4 sm:$0xff]   ;;  %v3967_v20 = vld [vmem:[#allocation6 + $0xe0] ss:$16 sps:$4 sm:$0xff]   ;;  %v3966_v39 = vld [vmem:[#allocation6 + $0xcc] ss:$16 sps:$4 sm:$0xff]  }
  0xaa   :  { %2145 = vmatprep.subr.bf16.mxu0 %v3933_v49  ;;  %v3975_v21 = vld [vmem:[#allocation6 + $0x104] ss:$16 sps:$4 sm:$0xff]   ;;  %v3973_v24 = vld [vmem:[#allocation6 + $0x100] ss:$16 sps:$4 sm:$0xff]   ;;  %v3984_v48 = vld [vmem:[#allocation6 + $0x12c] ss:$16 sps:$4 sm:$0xff]  }
  0xab   :  { %v3981_v25 = vld [vmem:[#allocation6 + $0x124] ss:$16 sps:$4 sm:$0xff]   ;;  %v3979_v28 = vld [vmem:[#allocation6 + $0x120] ss:$16 sps:$4 sm:$0xff]   ;;  %v3982_v49 = vld [vmem:[#allocation6 + $0x128] ss:$16 sps:$4 sm:$0xff]  }
  0xac   :  { %435 = vmatpush1.bf16.msra.mxu1 %v3412_v44  ;;  %v3987_v29 = vld [vmem:[#allocation6 + $0x144] ss:$16 sps:$4 sm:$0xff]   ;;  %v3985_v32 = vld [vmem:[#allocation6 + $0x140] ss:$16 sps:$4 sm:$0xff]   ;;  %v4006_v57 = vld [vmem:[#allocation6 + $0x1a8] ss:$16 sps:$4 sm:$0xff]  }
  0xad   :  { %436 = vmatprep.subr.bf16.mxu1 %v3421_v46  ;;  %2146 = vmatpush1.bf16.msra.mxu0 %v3931_v54  ;;  %v3993_v33 = vld [vmem:[#allocation6 + $0x164] ss:$16 sps:$4 sm:$0xff]   ;;  %v3997_v40 = vld [vmem:[#allocation6 + $0x180] ss:$16 sps:$4 sm:$0xff]   ;;  %v3978_v46 = vld [vmem:[#allocation6 + $0x10c] ss:$16 sps:$4 sm:$0xff]  }
  0xae   :  { %2147 = vmatprep.subr.bf16.mxu0 %v3939_v55  ;;  %v3999_v37 = vld [vmem:[#allocation6 + $0x184] ss:$16 sps:$4 sm:$0xff]   ;;  %v4003_v44 = vld [vmem:[#allocation6 + $0x1a0] ss:$16 sps:$4 sm:$0xff]   ;;  %v4002_v54 = vld [vmem:[#allocation6 + $0x18c] ss:$16 sps:$4 sm:$0xff]  }
  0xaf   :  { %v4005_v41 = vld [vmem:[#allocation6 + $0x1a4] ss:$16 sps:$4 sm:$0xff]   ;;  %v4000_v55 = vld [vmem:[#allocation6 + $0x188] ss:$16 sps:$4 sm:$0xff]   ;;  %v4020_v63 = vld [vmem:[#allocation6 + $0x1ec] ss:$16 sps:$4 sm:$0xff]  }
  0xb0   :  { %437 = vmatpush1.bf16.msra.mxu1 %v3420_v50  ;;  %v3990_v50 = vld [vmem:[#allocation6 + $0x14c] ss:$16 sps:$4 sm:$0xff]   ;;  %v4018_v2 = vld [vmem:[#allocation6 + $0x1e8] ss:$16 sps:$4 sm:$0xff]  }
  0xb1   :  { %438 = vmatprep.subr.bf16.mxu1 %v3429_v52  ;;  %2148 = vmatpush1.bf16.msra.mxu0 %v3937_v60  ;;  %v3996_v52 = vld [vmem:[#allocation6 + $0x16c] ss:$16 sps:$4 sm:$0xff]   ;;  %v4009_v60 = vld [vmem:[#allocation6 + $0x1c0] ss:$16 sps:$4 sm:$0xff]  }
  0xb2   :  { %2149 = vmatprep.subr.bf16.mxu0 %v3945_v61  ;;  %v4012_v61 = vld [vmem:[#allocation6 + $0x1c8] ss:$16 sps:$4 sm:$0xff]  }
  0xb3   :  { %v4839_v8 = vld [vmem:[#allocation4] sm:$0xff] }
  0xb4   :  { %439 = vmatpush1.bf16.msra.mxu1 %v3428_v56  ;;  %v4008_v56 = vld [vmem:[#allocation6 + $0x1ac] ss:$16 sps:$4 sm:$0xff]  }
  0xb5   :  { %518 = vmatprep.subr.bf16.mxu1 %v3409_v58  ;;  %2150 = vmatpush1.bf16.msra.mxu0 %v3943_v3  ;;  %v4011_v58 = vld [vmem:[#allocation6 + $0x1c4] ss:$16 sps:$4 sm:$0xff]  }
  0xb6   :  { %2151 = vmatprep.subr.bf16.mxu0 %v3951_v4  ;;  %v4023_v3 = vld [vmem:[#allocation6 + $0x204] ss:$16 sps:$4 sm:$0xff]   ;;  %v4026_v4 = vld [vmem:[#allocation6 + $0x20c] ss:$16 sps:$4 sm:$0xff]  }
  0xb7   :  { %3435 = vmatmul.mubr.msk.bf16.vlgmr.msra.gmra.mrb[4].mxu1 %vm385_vm0, %v4822_v36 }
  0xb8   :  { %519 = vmatpush1.bf16.msra.mxu1 %v3408_v62  ;;  %550 = vmatprep.mubr.bf16.mxu1 %v4641_v0  ;;  %v3961_v0 = vld [vmem:[#allocation6 + $0xc0] ss:$16 sps:$4 sm:$0xff]   ;;  %v4017_v62 = vld [vmem:[#allocation6 + $0x1e4] ss:$16 sps:$4 sm:$0xff]  }
  0xb9   :  { %520 = vmatprep.subr.bf16.mxu1 %v3417_v1  ;;  %2152 = vmatpush1.bf16.msra.mxu0 %v3949_v9  ;;  %v4015_v1 = vld [vmem:[#allocation6 + $0x1e0] ss:$16 sps:$4 sm:$0xff]  }
  0xba   :  { %2153 = vmatprep.subr.bf16.mxu0 %v3957_v10 }
  0xbc   :  { %521 = vmatpush1.bf16.msra.mxu1 %v3416_v5  ;;  %v180_v5 = vlaneseq }
  0xbd   :  { %522 = vmatprep.subr.bf16.mxu1 %v3425_v7  ;;  %2154 = vmatpush1.bf16.msra.mxu0 %v3955_v13 }
  0xbe   :  { %2155 = vmatprep.subr.bf16.mxu0 %v3963_v14  ;;  %v4834_v6 = vshrl.u32 %v180_v5, 7  ;;  %v4042_v5 = vld [vmem:[#allocation6 + $0x268] ss:$16 sps:$4 sm:$0xff]  }
  0xc0   :  { %523 = vmatpush1.bf16.msra.mxu1 %v3424_v11  ;;  %v4837_v7 = vsub.s32 0, %v4834_v6  ;;  %v4842_v9 = vsub.s32 1, %v4834_v6  ;;  %v202_v14 = vsub.s32 5, %v4834_v6 }
  0xc1   :  { %524 = vmatprep.subr.bf16.mxu1 %v3433_v12  ;;  %2156 = vmatpush1.bf16.msra.mxu0 %v3961_v0  ;;  %v198_v12 = vsub.s32 4, %v4834_v6 }
  0xc2   :  { %2157 = vmatprep.subr.bf16.mxu0 %v3969_v18  ;;  %v183_v10 = vrot.slane %v4839_v8, %v4837_v7  ;;  %v187_v11 = vrot.slane %v4839_v8, %v4842_v9 }
  0xc4   :  { %525 = vmatpush1.bf16.msra.mxu1 %v3432_v15 }
  0xc5   :  { %2315 = vmatprep.subr.bf16.mxu1 %v3930_v16  ;;  %2158 = vmatpush1.bf16.msra.mxu0 %v3967_v20  ;;  %v199_v20 = vrot.slane %v4839_v8, %v198_v12  ;;  %v4047_v12 = vld [vmem:[#allocation6 + $0x284] ss:$16 sps:$4 sm:$0xff]  }
  0xc6   :  { %2159 = vmatprep.subr.bf16.mxu0 %v3975_v21 }
  0xc7   :  { %3437 = vmatmul.mubr.msk.bf16.vlgmr.msra.gmra.mrb[8].mxu1 %vm385_vm0, %v4822_v36  ;;  %v3991_v36 = vld [vmem:[#allocation6 + $0x160] ss:$16 sps:$4 sm:$0xff]  }
  0xc8   :  { %2316 = vmatpush1.bf16.msra.mxu1 %v3928_v17 }
  0xc9   :  { %2317 = vmatprep.subr.bf16.mxu1 %v3936_v19  ;;  %2160 = vmatpush1.bf16.msra.mxu0 %v3973_v24 }
  0xca   :  { %2161 = vmatprep.subr.bf16.mxu0 %v3981_v25 }
  0xcc   :  { %2318 = vmatpush1.bf16.msra.mxu1 %v3934_v22  ;;  %v203_v22 = vrot.slane %v4839_v8, %v202_v14 }
  0xcd   :  { %2319 = vmatprep.subr.bf16.mxu1 %v3942_v23  ;;  %2162 = vmatpush1.bf16.msra.mxu0 %v3979_v28 }
  0xce   :  { %2163 = vmatprep.subr.bf16.mxu0 %v3987_v29  ;;  %v4021_v29 = vld [vmem:[#allocation6 + $0x200] ss:$16 sps:$4 sm:$0xff]  }
  0xd0   :  { %2320 = vmatpush1.bf16.msra.mxu1 %v3940_v26 }
  0xd1   :  { %2321 = vmatprep.subr.bf16.mxu1 %v3948_v27  ;;  %2164 = vmatpush1.bf16.msra.mxu0 %v3985_v32 }
  0xd2   :  { %2165 = vmatprep.subr.bf16.mxu0 %v3993_v33  ;;  %v4024_v33 = vld [vmem:[#allocation6 + $0x208] ss:$16 sps:$4 sm:$0xff]  }
  0xd4   :  { %2322 = vmatpush1.bf16.msra.mxu1 %v3946_v30 }
  0xd5   :  { %2323 = vmatprep.subr.bf16.mxu1 %v3954_v31  ;;  %2166 = vmatpush1.bf16.msra.mxu0 %v3991_v36 }
  0xd6   :  { %2167 = vmatprep.subr.bf16.mxu0 %v3999_v37  ;;  %v4032_v37 = vld [vmem:[#allocation6 + $0x22c] ss:$16 sps:$4 sm:$0xff]  }
  0xd8   :  { %2324 = vmatpush1.bf16.msra.mxu1 %v3952_v34  ;;  %v4029_v34 = vld [vmem:[#allocation6 + $0x224] ss:$16 sps:$4 sm:$0xff]  }
  0xd9   :  { %2325 = vmatprep.subr.bf16.mxu1 %v3960_v35  ;;  %2168 = vmatpush1.bf16.msra.mxu0 %v3997_v40 }
  0xda   :  { %2169 = vmatprep.subr.bf16.mxu0 %v4005_v41 }
  0xdc   :  { %2326 = vmatpush1.bf16.msra.mxu1 %v3958_v38  ;;  %v190_v38 = vsub.s32 2, %v4834_v6 }
  0xdd   :  { %2327 = vmatprep.subr.bf16.mxu1 %v3966_v39  ;;  %2170 = vmatpush1.bf16.msra.mxu0 %v4003_v44 }
  0xde   :  { %2171 = vmatprep.subr.bf16.mxu0 %v4011_v58  ;;  %v4041_v58 = vld [vmem:[#allocation6 + $0x264] ss:$16 sps:$4 sm:$0xff]  }
  0xe0   :  { %2328 = vmatpush1.bf16.msra.mxu1 %v3964_v42  ;;  %v194_v42 = vsub.s32 3, %v4834_v6 }
  0xe1   :  { %2329 = vmatprep.subr.bf16.mxu1 %v3972_v43  ;;  %2172 = vmatpush1.bf16.msra.mxu0 %v4009_v60 }
  0xe2   :  { %2173 = vmatprep.subr.bf16.mxu0 %v4017_v62 }
  0xe4   :  { %2330 = vmatpush1.bf16.msra.mxu1 %v3970_v45 }
  0xe5   :  { %2331 = vmatprep.subr.bf16.mxu1 %v3978_v46  ;;  %2174 = vmatpush1.bf16.msra.mxu0 %v4015_v1  ;;  %v4027_v46 = vld [vmem:[#allocation6 + $0x220] ss:$16 sps:$4 sm:$0xff]  }
  0xe6   :  { %2186 = vmatprep.subr.bf16.mxu0 %v4023_v3 }
  0xe8   :  { %2332 = vmatpush1.bf16.msra.mxu1 %v3976_v47  ;;  %v4030_v47 = vld [vmem:[#allocation6 + $0x228] ss:$16 sps:$4 sm:$0xff]  }
  0xe9   :  { %2333 = vmatprep.subr.bf16.mxu1 %v3984_v48 }
  0xec   :  { %2334 = vmatpush1.bf16.msra.mxu1 %v3982_v49  ;;  %v4035_v49 = vld [vmem:[#allocation6 + $0x244] ss:$16 sps:$4 sm:$0xff]  }
  0xed   :  { %2335 = vmatprep.subr.bf16.mxu1 %v3990_v50  ;;  %v4038_v50 = vld [vmem:[#allocation6 + $0x24c] ss:$16 sps:$4 sm:$0xff]  }
  0xf0   :  { %2336 = vmatpush1.bf16.msra.mxu1 %v3988_v51  ;;  %v191_v51 = vrot.slane %v4839_v8, %v190_v38 }
  0xf1   :  { %2337 = vmatprep.subr.bf16.mxu1 %v3996_v52 }
  0xf4   :  { %2338 = vmatpush1.bf16.msra.mxu1 %v3994_v53  ;;  %v195_v53 = vrot.slane %v4839_v8, %v194_v42 }
  0xf5   :  { %2339 = vmatprep.subr.bf16.mxu1 %v4002_v54 }
  0xf8   :  { %2340 = vmatpush1.bf16.msra.mxu1 %v4000_v55  ;;  %v4033_v55 = vld [vmem:[#allocation6 + $0x240] ss:$16 sps:$4 sm:$0xff]  }
  0xf9   :  { %2341 = vmatprep.subr.bf16.mxu1 %v4008_v56  ;;  %v4036_v56 = vld [vmem:[#allocation6 + $0x248] ss:$16 sps:$4 sm:$0xff]  }
  0xfc   :  { %2342 = vmatpush1.bf16.msra.mxu1 %v4006_v57 }
  0xfd   :  { %2343 = vmatprep.subr.bf16.mxu1 %v4014_v59  ;;  %v4044_v59 = vld [vmem:[#allocation6 + $0x26c] ss:$16 sps:$4 sm:$0xff]  }
 0x100   :  { %2344 = vmatpush1.bf16.msra.mxu1 %v4012_v61 }
 0x101   :  { %2345 = vmatprep.subr.bf16.mxu1 %v4020_v63 }
 0x104   :  { %2346 = vmatpush1.bf16.msra.mxu1 %v4018_v2 }
 0x105   :  { %2358 = vmatprep.subr.bf16.mxu1 %v4026_v4  ;;  %v4039_v4 = vld [vmem:[#allocation6 + $0x260] ss:$16 sps:$4 sm:$0xff]  }
 0x17a   :  { %v423_v13 = vpop.f32.mrb[0].mxu1  ;;  %v509_v27 = vpop.f32.mrb[0].mxu0 }
 0x17b   :  { %v424_v15 = vadd.f32 %v423_v13, %v183_v10  ;;  %v425_v16 = vpop.f32.mrb[1].mxu1  ;;  %v510_v30 = vadd.f32 %v509_v27, %v199_v20  ;;  %v511_v31 = vpop.f32.mrb[1].mxu0  ;;  %v4050_v13 = vld [vmem:[#allocation6 + $0x28c] ss:$16 sps:$4 sm:$0xff]   ;;  %v4065_v27 = vld [vmem:[#allocation6 + $0x2e4] ss:$16 sps:$4 sm:$0xff]  }
 0x17c   :  { %v426_v0 = vadd.f32 %v425_v16, %v187_v11  ;;  %v427_v17 = vpop.f32.mrb[2].mxu1  ;;  %v512_v35 = vadd.f32 %v511_v31, %v203_v22  ;;  %v513_v36 = vpop.f32.mrb[2].mxu0  ;;  %v4071_v31 = vld [vmem:[#allocation6 + $0x304] ss:$16 sps:$4 sm:$0xff]  }
 0x17d   :  { %v428_v18 = vadd.f32 %v427_v17, %v183_v10  ;;  %v429_v19 = vpop.f32.mrb[3].mxu1  ;;  %v561_v23 = vmax.f32 %v424_v15, 0.0  ;;  %v565_v39 = vmax.f32 %v510_v30, 0.0  ;;  %v514_v40 = vadd.f32 %v513_v36, %v199_v20  ;;  %v515_v41 = vpop.f32.mrb[3].mxu0  ;;  %v4048_v17 = vld [vmem:[#allocation6 + $0x288] ss:$16 sps:$4 sm:$0xff]  }
 0x17e   :  { %v430_v21 = vadd.f32 %v429_v19, %v187_v11  ;;  %v562_v25 = vmax.f32 %v426_v0, 0.0  ;;  %v566_v43 = vmax.f32 %v512_v35, 0.0  ;;  %v516_v44 = vadd.f32 %v515_v41, %v203_v22  ;;  %v4045_v0 = vld [vmem:[#allocation6 + $0x280] ss:$16 sps:$4 sm:$0xff]   ;;  %v4053_v19 = vld [vmem:[#allocation6 + $0x2a4] ss:$16 sps:$4 sm:$0xff]  }
 0x17f   :  { %v569_v24 = vmax.f32 %v428_v18, 0.0  ;;  %v573_v45 = vmax.f32 %v514_v40, 0.0  ;;  %v4056_v20 = vld [vmem:[#allocation6 + $0x2ac] ss:$16 sps:$4 sm:$0xff]   ;;  %v4054_v22 = vld [vmem:[#allocation6 + $0x2a8] ss:$16 sps:$4 sm:$0xff]  }
 0x180   :  { %v570_v26 = vmax.f32 %v430_v21, 0.0  ;;  %v574_v48 = vmax.f32 %v516_v44, 0.0  ;;  %v4051_v21 = vld [vmem:[#allocation6 + $0x2a0] ss:$16 sps:$4 sm:$0xff]   ;;  %v4066_v30 = vld [vmem:[#allocation6 + $0x2e8] ss:$16 sps:$4 sm:$0xff]  }
 0x181   :  { %v577_v28 = vpack.c.bf16 %v569_v24, %v561_v23  ;;  %v4857_v52 = vpack.c.bf16 %v573_v45, %v565_v39  ;;  %v4059_v23 = vld [vmem:[#allocation6 + $0x2c4] ss:$16 sps:$4 sm:$0xff]   ;;  %v4062_v24 = vld [vmem:[#allocation6 + $0x2cc] ss:$16 sps:$4 sm:$0xff]   ;;  %v4078_v39 = vld [vmem:[#allocation6 + $0x328] ss:$16 sps:$4 sm:$0xff]  }
 0x182   :  { %v578_v32 = vpack.c.bf16 %v570_v26, %v562_v25  ;;  %v4862_v54 = vpack.c.bf16 %v574_v48, %v566_v43  ;;  %v4057_v25 = vld [vmem:[#allocation6 + $0x2c0] ss:$16 sps:$4 sm:$0xff]   ;;  %v4060_v26 = vld [vmem:[#allocation6 + $0x2c8] ss:$16 sps:$4 sm:$0xff]   ;;  %v4077_v35 = vld [vmem:[#allocation6 + $0x324] ss:$16 sps:$4 sm:$0xff]  }
 0x183   :  { %v4080_v36 = vld [vmem:[#allocation6 + $0x32c] ss:$16 sps:$4 sm:$0xff]   ;;  %v4083_v40 = vld [vmem:[#allocation6 + $0x344] ss:$16 sps:$4 sm:$0xff]   ;;  %v4081_v43 = vld [vmem:[#allocation6 + $0x340] ss:$16 sps:$4 sm:$0xff]  }
 0x184   :  { %2175 = vmatprep.mubr.bf16.mxu0 %v578_v32  ;;  %2347 = vmatprep.mubr.bf16.mxu1 %v578_v32  ;;  %v4074_v32 = vld [vmem:[#allocation6 + $0x30c] ss:$16 sps:$4 sm:$0xff]   ;;  %v4084_v44 = vld [vmem:[#allocation6 + $0x348] ss:$16 sps:$4 sm:$0xff]   ;;  %v4089_v45 = vld [vmem:[#allocation6 + $0x364] ss:$16 sps:$4 sm:$0xff]  }
 0x185   :  { %2176 = vmatmul.mubr.bf16.vlgmr.msra.gmra.mrb[4].mxu0 %v577_v28  ;;  %2348 = vmatmul.mubr.bf16.vlgmr.msra.gmra.mrb[12].mxu1 %v577_v28  ;;  %v4068_v28 = vld [vmem:[#allocation6 + $0x2ec] ss:$16 sps:$4 sm:$0xff]   ;;  %v4090_v48 = vld [vmem:[#allocation6 + $0x368] ss:$16 sps:$4 sm:$0xff]  }
 0x186   :  { %2187 = vmatpush1.bf16.msra.mxu0 %v4021_v29  ;;  %2359 = vmatpush1.bf16.msra.mxu1 %v4024_v33  ;;  %v4063_v29 = vld [vmem:[#allocation6 + $0x2e0] ss:$16 sps:$4 sm:$0xff]   ;;  %v4086_v41 = vld [vmem:[#allocation6 + $0x34c] ss:$16 sps:$4 sm:$0xff]  }
 0x187   :  { %2188 = vmatprep.subr.bf16.mxu0 %v4029_v34  ;;  %2360 = vmatprep.subr.bf16.mxu1 %v4032_v37  ;;  %v4069_v33 = vld [vmem:[#allocation6 + $0x300] ss:$16 sps:$4 sm:$0xff]   ;;  %v4072_v34 = vld [vmem:[#allocation6 + $0x308] ss:$16 sps:$4 sm:$0xff]  }
 0x188   :  { %v4075_v37 = vld [vmem:[#allocation6 + $0x320] ss:$16 sps:$4 sm:$0xff]  }
 0x18a   :  { %2189 = vmatpush1.bf16.msra.mxu0 %v4027_v46  ;;  %2361 = vmatpush1.bf16.msra.mxu1 %v4030_v47  ;;  %v466_v57 = vpop.f32.mrb[4].mxu1  ;;  %v4092_v46 = vld [vmem:[#allocation6 + $0x36c] ss:$16 sps:$4 sm:$0xff]   ;;  %v4087_v47 = vld [vmem:[#allocation6 + $0x360] ss:$16 sps:$4 sm:$0xff]  }
 0x18b   :  { %2190 = vmatprep.subr.bf16.mxu0 %v4035_v49  ;;  %2362 = vmatprep.subr.bf16.mxu1 %v4038_v50  ;;  %v467_v60 = vadd.f32 %v466_v57, %v191_v51  ;;  %v468_v61 = vpop.f32.mrb[5].mxu1  ;;  %v4095_v49 = vld [vmem:[#allocation6 + $0x384] ss:$16 sps:$4 sm:$0xff]   ;;  %v4098_v50 = vld [vmem:[#allocation6 + $0x38c] ss:$16 sps:$4 sm:$0xff]  }
 0x18c   :  { %v469_v62 = vadd.f32 %v468_v61, %v195_v53  ;;  %v470_v63 = vpop.f32.mrb[6].mxu1  ;;  %v4099_v57 = vld [vmem:[#allocation6 + $0x3a0] ss:$16 sps:$4 sm:$0xff]   ;;  %v210_v61 = vsub.s32 7, %v4834_v6 }
 0x18d   :  { %v563_v1 = vmax.f32 %v467_v60, 0.0  ;;  %v471_v2 = vadd.f32 %v470_v63, %v191_v51  ;;  %v472_v3 = vpop.f32.mrb[7].mxu1  ;;  %v4093_v51 = vld [vmem:[#allocation6 + $0x380] ss:$16 sps:$4 sm:$0xff]   ;;  %v4110_v63 = vld [vmem:[#allocation6 + $0x3cc] ss:$16 sps:$4 sm:$0xff]  }
 0x18e   :  { %2191 = vmatpush1.bf16.msra.mxu0 %v4033_v55  ;;  %2363 = vmatpush1.bf16.msra.mxu1 %v4036_v56  ;;  %v564_v10 = vmax.f32 %v469_v62, 0.0  ;;  %v473_v11 = vadd.f32 %v472_v3, %v195_v53  ;;  %v4096_v53 = vld [vmem:[#allocation6 + $0x388] ss:$16 sps:$4 sm:$0xff]   ;;  %v4101_v55 = vld [vmem:[#allocation6 + $0x3a4] ss:$16 sps:$4 sm:$0xff]   ;;  %v211_v3 = vrot.slane %v4839_v8, %v210_v61 }
 0x18f   :  { %2192 = vmatprep.subr.bf16.mxu0 %v4041_v58  ;;  %2364 = vmatprep.subr.bf16.mxu1 %v4044_v59  ;;  %v571_v14 = vmax.f32 %v471_v2, 0.0  ;;  %v4104_v56 = vld [vmem:[#allocation6 + $0x3ac] ss:$16 sps:$4 sm:$0xff]   ;;  %v4102_v58 = vld [vmem:[#allocation6 + $0x3a8] ss:$16 sps:$4 sm:$0xff]   ;;  %v206_v59 = vsub.s32 6, %v4834_v6 }
 0x190   :  { %v572_v15 = vmax.f32 %v473_v11, 0.0  ;;  %v4107_v62 = vld [vmem:[#allocation6 + $0x3c4] ss:$16 sps:$4 sm:$0xff]   ;;  %v4108_v11 = vld [vmem:[#allocation6 + $0x3c8] ss:$16 sps:$4 sm:$0xff]  }
 0x191   :  { %v4864_v16 = vpack.c.bf16 %v571_v14, %v563_v1  ;;  %v207_v2 = vrot.slane %v4839_v8, %v206_v59  ;;  %v4111_v8 = vld [vmem:[#allocation6 + $0x3e0] ss:$16 sps:$4 sm:$0xff]   ;;  %v4167_v59 = vld [vmem:[#allocation6 + $0x504] ss:$16 sps:$4 sm:$0xff]  }
 0x192   :  { %2193 = vmatpush1.bf16.msra.mxu0 %v4039_v4  ;;  %2365 = vmatpush1.bf16.msra.mxu1 %v4042_v5  ;;  %v580_v18 = vpack.c.bf16 %v572_v15, %v564_v10  ;;  %v4105_v10 = vld [vmem:[#allocation6 + $0x3c0] ss:$16 sps:$4 sm:$0xff]   ;;  %v4113_v15 = vld [vmem:[#allocation6 + $0x3e4] ss:$16 sps:$4 sm:$0xff]  }
 0x193   :  { %2194 = vmatprep.subr.bf16.mxu0 %v4047_v12  ;;  %2366 = vmatprep.subr.bf16.mxu1 %v4050_v13  ;;  %v4165_v61 = vld [vmem:[#allocation6 + $0x500] ss:$16 sps:$4 sm:$0xff]  }
 0x194   :  { %2218 = vmatprep.mubr.bf16.mxu0 %v580_v18  ;;  %2390 = vmatprep.mubr.bf16.mxu1 %v580_v18 }
 0x196   :  { %2195 = vmatpush1.bf16.msra.mxu0 %v4045_v0  ;;  %2367 = vmatpush1.bf16.msra.mxu1 %v4048_v17  ;;  %v4116_v0 = vld [vmem:[#allocation6 + $0x3ec] ss:$16 sps:$4 sm:$0xff]  }
 0x197   :  { %2196 = vmatprep.subr.bf16.mxu0 %v4053_v19  ;;  %2368 = vmatprep.subr.bf16.mxu1 %v4056_v20 }
 0x19a   :  { %2197 = vmatpush1.bf16.msra.mxu0 %v4051_v21  ;;  %2369 = vmatpush1.bf16.msra.mxu1 %v4054_v22  ;;  %v552_v60 = vpop.f32.mrb[8].mxu1  ;;  %v4114_v22 = vld [vmem:[#allocation6 + $0x3e8] ss:$16 sps:$4 sm:$0xff]  }
 0x19b   :  { %2198 = vmatprep.subr.bf16.mxu0 %v4059_v23  ;;  %2370 = vmatprep.subr.bf16.mxu1 %v4062_v24  ;;  %v554_v1 = vpop.f32.mrb[9].mxu1  ;;  %v553_v12 = vadd.f32 %v552_v60, %v207_v2  ;;  %v4119_v24 = vld [vmem:[#allocation6 + $0x404] ss:$16 sps:$4 sm:$0xff]   ;;  %v4170_v60 = vld [vmem:[#allocation6 + $0x50c] ss:$16 sps:$4 sm:$0xff]  }
 0x19c   :  { %v556_v4 = vpop.f32.mrb[10].mxu1  ;;  %v555_v13 = vadd.f32 %v554_v1, %v211_v3  ;;  %v4176_v1 = vld [vmem:[#allocation6 + $0x52c] ss:$16 sps:$4 sm:$0xff]  }
 0x19d   :  { %v558_v5 = vpop.f32.mrb[11].mxu1  ;;  %v557_v14 = vadd.f32 %v556_v4, %v207_v2  ;;  %v567_v18 = vmax.f32 %v553_v12, 0.0  ;;  %v4171_v2 = vld [vmem:[#allocation6 + $0x520] ss:$16 sps:$4 sm:$0xff]   ;;  %v4179_v4 = vld [vmem:[#allocation6 + $0x544] ss:$16 sps:$4 sm:$0xff]  }
 0x19e   :  { %2199 = vmatpush1.bf16.msra.mxu0 %v4057_v25  ;;  %2371 = vmatpush1.bf16.msra.mxu1 %v4060_v26  ;;  %v559_v17 = vadd.f32 %v558_v5, %v211_v3  ;;  %v568_v19 = vmax.f32 %v555_v13, 0.0  ;;  %v4122_v25 = vld [vmem:[#allocation6 + $0x40c] ss:$16 sps:$4 sm:$0xff]   ;;  %v4174_v3 = vld [vmem:[#allocation6 + $0x528] ss:$16 sps:$4 sm:$0xff]  }
 0x19f   :  { %2200 = vmatprep.subr.bf16.mxu0 %v4065_v27  ;;  %2372 = vmatprep.subr.bf16.mxu1 %v4068_v28  ;;  %v575_v20 = vmax.f32 %v557_v14, 0.0  ;;  %v4117_v27 = vld [vmem:[#allocation6 + $0x400] ss:$16 sps:$4 sm:$0xff]   ;;  %v4120_v28 = vld [vmem:[#allocation6 + $0x408] ss:$16 sps:$4 sm:$0xff]  }
 0x1a0   :  { %v576_v21 = vmax.f32 %v559_v17, 0.0  ;;  %v4182_v5 = vld [vmem:[#allocation6 + $0x54c] ss:$16 sps:$4 sm:$0xff]   ;;  %v4185_v12 = vld [vmem:[#allocation6 + $0x564] ss:$16 sps:$4 sm:$0xff]  }
 0x1a1   :  { %v4870_v23 = vpack.c.bf16 %v575_v20, %v567_v18  ;;  %v4188_v13 = vld [vmem:[#allocation6 + $0x56c] ss:$16 sps:$4 sm:$0xff]   ;;  %v4183_v14 = vld [vmem:[#allocation6 + $0x560] ss:$16 sps:$4 sm:$0xff]   ;;  %v4197_v20 = vld [vmem:[#allocation6 + $0x5a4] ss:$16 sps:$4 sm:$0xff]  }
 0x1a2   :  { %2201 = vmatpush1.bf16.msra.mxu0 %v4063_v29  ;;  %2373 = vmatpush1.bf16.msra.mxu1 %v4066_v30  ;;  %v4872_v26 = vpack.c.bf16 %v576_v21, %v568_v19  ;;  %v4125_v29 = vld [vmem:[#allocation6 + $0x424] ss:$16 sps:$4 sm:$0xff]   ;;  %v4128_v30 = vld [vmem:[#allocation6 + $0x42c] ss:$16 sps:$4 sm:$0xff]   ;;  %v4189_v18 = vld [vmem:[#allocation6 + $0x580] ss:$16 sps:$4 sm:$0xff]  }
 0x1a3   :  { %2202 = vmatprep.subr.bf16.mxu0 %v4071_v31  ;;  %2374 = vmatprep.subr.bf16.mxu1 %v4074_v32  ;;  %v4123_v31 = vld [vmem:[#allocation6 + $0x420] ss:$16 sps:$4 sm:$0xff]   ;;  %v4126_v32 = vld [vmem:[#allocation6 + $0x428] ss:$16 sps:$4 sm:$0xff]   ;;  %v4194_v17 = vld [vmem:[#allocation6 + $0x58c] ss:$16 sps:$4 sm:$0xff]  }
 0x1a4   :  { %v4192_v19 = vld [vmem:[#allocation6 + $0x588] ss:$16 sps:$4 sm:$0xff]   ;;  %v4200_v21 = vld [vmem:[#allocation6 + $0x5ac] ss:$16 sps:$4 sm:$0xff]  }
 0x1a6   :  { %2203 = vmatpush1.bf16.msra.mxu0 %v4069_v33  ;;  %2375 = vmatpush1.bf16.msra.mxu1 %v4072_v34  ;;  %v4131_v33 = vld [vmem:[#allocation6 + $0x444] ss:$16 sps:$4 sm:$0xff]   ;;  %v4134_v34 = vld [vmem:[#allocation6 + $0x44c] ss:$16 sps:$4 sm:$0xff]  }
 0x1a7   :  { %2204 = vmatprep.subr.bf16.mxu0 %v4077_v35  ;;  %2376 = vmatprep.subr.bf16.mxu1 %v4080_v36  ;;  %v4129_v35 = vld [vmem:[#allocation6 + $0x440] ss:$16 sps:$4 sm:$0xff]   ;;  %v4132_v36 = vld [vmem:[#allocation6 + $0x448] ss:$16 sps:$4 sm:$0xff]  }
 0x1aa   :  { %2205 = vmatpush1.bf16.msra.mxu0 %v4075_v37  ;;  %2377 = vmatpush1.bf16.msra.mxu1 %v4078_v39  ;;  %v4137_v37 = vld [vmem:[#allocation6 + $0x464] ss:$16 sps:$4 sm:$0xff]   ;;  %v4135_v39 = vld [vmem:[#allocation6 + $0x460] ss:$16 sps:$4 sm:$0xff]  }
 0x1ab   :  { %2206 = vmatprep.subr.bf16.mxu0 %v4083_v40  ;;  %2378 = vmatprep.subr.bf16.mxu1 %v4086_v41  ;;  %v4138_v40 = vld [vmem:[#allocation6 + $0x468] ss:$16 sps:$4 sm:$0xff]   ;;  %v4143_v41 = vld [vmem:[#allocation6 + $0x484] ss:$16 sps:$4 sm:$0xff]  }
 0x1ae   :  { %2207 = vmatpush1.bf16.msra.mxu0 %v4081_v43  ;;  %2379 = vmatpush1.bf16.msra.mxu1 %v4084_v44  ;;  %v4146_v43 = vld [vmem:[#allocation6 + $0x48c] ss:$16 sps:$4 sm:$0xff]   ;;  %v4141_v44 = vld [vmem:[#allocation6 + $0x480] ss:$16 sps:$4 sm:$0xff]  }
 0x1af   :  { %2208 = vmatprep.subr.bf16.mxu0 %v4089_v45  ;;  %2380 = vmatprep.subr.bf16.mxu1 %v4092_v46  ;;  %v4149_v45 = vld [vmem:[#allocation6 + $0x4a4] ss:$16 sps:$4 sm:$0xff]   ;;  %v4152_v46 = vld [vmem:[#allocation6 + $0x4ac] ss:$16 sps:$4 sm:$0xff]  }
 0x1b2   :  { %2209 = vmatpush1.bf16.msra.mxu0 %v4087_v47  ;;  %2381 = vmatpush1.bf16.msra.mxu1 %v4090_v48  ;;  %v4147_v47 = vld [vmem:[#allocation6 + $0x4a0] ss:$16 sps:$4 sm:$0xff]   ;;  %v4150_v48 = vld [vmem:[#allocation6 + $0x4a8] ss:$16 sps:$4 sm:$0xff]  }
 0x1b3   :  { %2210 = vmatprep.subr.bf16.mxu0 %v4095_v49  ;;  %2382 = vmatprep.subr.bf16.mxu1 %v4098_v50  ;;  %v4155_v49 = vld [vmem:[#allocation6 + $0x4c4] ss:$16 sps:$4 sm:$0xff]   ;;  %v4158_v50 = vld [vmem:[#allocation6 + $0x4cc] ss:$16 sps:$4 sm:$0xff]  }
 0x1b6   :  { %2211 = vmatpush1.bf16.msra.mxu0 %v4093_v51  ;;  %2383 = vmatpush1.bf16.msra.mxu1 %v4096_v53  ;;  %v4153_v51 = vld [vmem:[#allocation6 + $0x4c0] ss:$16 sps:$4 sm:$0xff]   ;;  %v4156_v53 = vld [vmem:[#allocation6 + $0x4c8] ss:$16 sps:$4 sm:$0xff]  }
 0x1b7   :  { %2212 = vmatprep.subr.bf16.mxu0 %v4101_v55  ;;  %2384 = vmatprep.subr.bf16.mxu1 %v4104_v56  ;;  %v4161_v55 = vld [vmem:[#allocation6 + $0x4e4] ss:$16 sps:$4 sm:$0xff]   ;;  %v4164_v56 = vld [vmem:[#allocation6 + $0x4ec] ss:$16 sps:$4 sm:$0xff]  }
 0x1ba   :  { %2213 = vmatpush1.bf16.msra.mxu0 %v4099_v57  ;;  %2385 = vmatpush1.bf16.msra.mxu1 %v4102_v58  ;;  %v4159_v57 = vld [vmem:[#allocation6 + $0x4e0] ss:$16 sps:$4 sm:$0xff]   ;;  %v4162_v58 = vld [vmem:[#allocation6 + $0x4e8] ss:$16 sps:$4 sm:$0xff]  }
 0x1bb   :  { %2214 = vmatprep.subr.bf16.mxu0 %v4107_v62  ;;  %2386 = vmatprep.subr.bf16.mxu1 %v4110_v63  ;;  %v4168_v62 = vld [vmem:[#allocation6 + $0x508] ss:$16 sps:$4 sm:$0xff]   ;;  %v4173_v63 = vld [vmem:[#allocation6 + $0x524] ss:$16 sps:$4 sm:$0xff]  }
 0x1be   :  { %2215 = vmatpush1.bf16.msra.mxu0 %v4105_v10  ;;  %2387 = vmatpush1.bf16.msra.mxu1 %v4108_v11  ;;  %v4177_v10 = vld [vmem:[#allocation6 + $0x540] ss:$16 sps:$4 sm:$0xff]   ;;  %v4180_v11 = vld [vmem:[#allocation6 + $0x548] ss:$16 sps:$4 sm:$0xff]  }
 0x1bf   :  { %2216 = vmatprep.subr.bf16.mxu0 %v4113_v15  ;;  %2388 = vmatprep.subr.bf16.mxu1 %v4116_v0  ;;  %v4186_v15 = vld [vmem:[#allocation6 + $0x568] ss:$16 sps:$4 sm:$0xff]   ;;  %v4191_v0 = vld [vmem:[#allocation6 + $0x584] ss:$16 sps:$4 sm:$0xff]  }
 0x1c2   :  { %2217 = vmatpush1.bf16.msra.mxu0 %v4111_v8  ;;  %2389 = vmatpush1.bf16.msra.mxu1 %v4114_v22  ;;  %v4195_v8 = vld [vmem:[#allocation6 + $0x5a0] ss:$16 sps:$4 sm:$0xff]   ;;  %v4198_v22 = vld [vmem:[#allocation6 + $0x5a8] ss:$16 sps:$4 sm:$0xff]  }
 0x1c3   :  { %2229 = vmatprep.subr.bf16.mxu0 %v4119_v24  ;;  %2401 = vmatprep.subr.bf16.mxu1 %v4122_v25  ;;  %v4203_v24 = vld [vmem:[#allocation6 + $0x5c4] ss:$16 sps:$4 sm:$0xff]   ;;  %v4206_v25 = vld [vmem:[#allocation6 + $0x5cc] ss:$16 sps:$4 sm:$0xff]  }
 0x1c5   :  { %2219 = vmatmul.mubr.bf16.vlgmr.msra.gmra.mrb[4].mxu0 %v4864_v16  ;;  %2391 = vmatmul.mubr.bf16.vlgmr.msra.gmra.mrb[12].mxu1 %v4864_v16  ;;  %v4140_v16 = vld [vmem:[#allocation6 + $0x46c] ss:$16 sps:$4 sm:$0xff]  }
 0x1c6   :  { %2230 = vmatpush1.bf16.msra.mxu0 %v4117_v27  ;;  %2402 = vmatpush1.bf16.msra.mxu1 %v4120_v28  ;;  %v4201_v27 = vld [vmem:[#allocation6 + $0x5c0] ss:$16 sps:$4 sm:$0xff]   ;;  %v4204_v28 = vld [vmem:[#allocation6 + $0x5c8] ss:$16 sps:$4 sm:$0xff]  }
 0x1c7   :  { %2231 = vmatprep.subr.bf16.mxu0 %v4125_v29  ;;  %2403 = vmatprep.subr.bf16.mxu1 %v4128_v30  ;;  %v4209_v29 = vld [vmem:[#allocation6 + $0x5e4] ss:$16 sps:$4 sm:$0xff]   ;;  %v4212_v30 = vld [vmem:[#allocation6 + $0x5ec] ss:$16 sps:$4 sm:$0xff]  }
 0x1c8   :  { %2261 = vmatprep.mubr.bf16.mxu0 %v4862_v54  ;;  %2433 = vmatprep.mubr.bf16.mxu1 %v4862_v54  ;;  %v4144_v54 = vld [vmem:[#allocation6 + $0x488] ss:$16 sps:$4 sm:$0xff]  }
 0x1ca   :  { %2232 = vmatpush1.bf16.msra.mxu0 %v4123_v31  ;;  %2404 = vmatpush1.bf16.msra.mxu1 %v4126_v32  ;;  %v4207_v31 = vld [vmem:[#allocation6 + $0x5e0] ss:$16 sps:$4 sm:$0xff]   ;;  %v4210_v32 = vld [vmem:[#allocation6 + $0x5e8] ss:$16 sps:$4 sm:$0xff]  }
 0x1cb   :  { %2233 = vmatprep.subr.bf16.mxu0 %v4131_v33  ;;  %2405 = vmatprep.subr.bf16.mxu1 %v4134_v34  ;;  %v4215_v33 = vld [vmem:[#allocation6 + $0x604] ss:$16 sps:$4 sm:$0xff]   ;;  %v4218_v34 = vld [vmem:[#allocation6 + $0x60c] ss:$16 sps:$4 sm:$0xff]  }
 0x1ce   :  { %2234 = vmatpush1.bf16.msra.mxu0 %v4129_v35  ;;  %2406 = vmatpush1.bf16.msra.mxu1 %v4132_v36  ;;  %v4213_v35 = vld [vmem:[#allocation6 + $0x600] ss:$16 sps:$4 sm:$0xff]   ;;  %v4216_v36 = vld [vmem:[#allocation6 + $0x608] ss:$16 sps:$4 sm:$0xff]  }
 0x1cf   :  { %2235 = vmatprep.subr.bf16.mxu0 %v4137_v37  ;;  %2407 = vmatprep.subr.bf16.mxu1 %v4140_v16  ;;  %v4221_v37 = vld [vmem:[#allocation6 + $0x624] ss:$16 sps:$4 sm:$0xff]   ;;  %v4224_v16 = vld [vmem:[#allocation6 + $0x62c] ss:$16 sps:$4 sm:$0xff]  }
 0x1d2   :  { %2236 = vmatpush1.bf16.msra.mxu0 %v4135_v39  ;;  %2408 = vmatpush1.bf16.msra.mxu1 %v4138_v40  ;;  %v4219_v39 = vld [vmem:[#allocation6 + $0x620] ss:$16 sps:$4 sm:$0xff]   ;;  %v4222_v40 = vld [vmem:[#allocation6 + $0x628] ss:$16 sps:$4 sm:$0xff]  }
 0x1d3   :  { %2237 = vmatprep.subr.bf16.mxu0 %v4143_v41  ;;  %2409 = vmatprep.subr.bf16.mxu1 %v4146_v43  ;;  %v4227_v41 = vld [vmem:[#allocation6 + $0x644] ss:$16 sps:$4 sm:$0xff]   ;;  %v4230_v43 = vld [vmem:[#allocation6 + $0x64c] ss:$16 sps:$4 sm:$0xff]  }
 0x1d6   :  { %2238 = vmatpush1.bf16.msra.mxu0 %v4141_v44  ;;  %2410 = vmatpush1.bf16.msra.mxu1 %v4144_v54  ;;  %v4225_v44 = vld [vmem:[#allocation6 + $0x640] ss:$16 sps:$4 sm:$0xff]   ;;  %v4228_v54 = vld [vmem:[#allocation6 + $0x648] ss:$16 sps:$4 sm:$0xff]  }
 0x1d7   :  { %2239 = vmatprep.subr.bf16.mxu0 %v4149_v45  ;;  %2411 = vmatprep.subr.bf16.mxu1 %v4152_v46  ;;  %v4233_v45 = vld [vmem:[#allocation6 + $0x664] ss:$16 sps:$4 sm:$0xff]   ;;  %v4231_v46 = vld [vmem:[#allocation6 + $0x660] ss:$16 sps:$4 sm:$0xff]  }
 0x1da   :  { %2240 = vmatpush1.bf16.msra.mxu0 %v4147_v47  ;;  %2412 = vmatpush1.bf16.msra.mxu1 %v4150_v48  ;;  %v4234_v47 = vld [vmem:[#allocation6 + $0x668] ss:$16 sps:$4 sm:$0xff]   ;;  %v4239_v48 = vld [vmem:[#allocation6 + $0x684] ss:$16 sps:$4 sm:$0xff]  }
 0x1db   :  { %2241 = vmatprep.subr.bf16.mxu0 %v4155_v49  ;;  %2413 = vmatprep.subr.bf16.mxu1 %v4158_v50  ;;  %v4242_v49 = vld [vmem:[#allocation6 + $0x68c] ss:$16 sps:$4 sm:$0xff]   ;;  %v4237_v50 = vld [vmem:[#allocation6 + $0x680] ss:$16 sps:$4 sm:$0xff]  }
 0x1de   :  { %2242 = vmatpush1.bf16.msra.mxu0 %v4153_v51  ;;  %2414 = vmatpush1.bf16.msra.mxu1 %v4156_v53  ;;  %v4245_v51 = vld [vmem:[#allocation6 + $0x6a4] ss:$16 sps:$4 sm:$0xff]   ;;  %v4248_v53 = vld [vmem:[#allocation6 + $0x6ac] ss:$16 sps:$4 sm:$0xff]  }
 0x1df   :  { %2243 = vmatprep.subr.bf16.mxu0 %v4161_v55  ;;  %2415 = vmatprep.subr.bf16.mxu1 %v4164_v56  ;;  %v4243_v55 = vld [vmem:[#allocation6 + $0x6a0] ss:$16 sps:$4 sm:$0xff]   ;;  %v4246_v56 = vld [vmem:[#allocation6 + $0x6a8] ss:$16 sps:$4 sm:$0xff]  }
 0x1e2   :  { %2244 = vmatpush1.bf16.msra.mxu0 %v4159_v57  ;;  %2416 = vmatpush1.bf16.msra.mxu1 %v4162_v58  ;;  %v4251_v57 = vld [vmem:[#allocation6 + $0x6c4] ss:$16 sps:$4 sm:$0xff]   ;;  %v4254_v58 = vld [vmem:[#allocation6 + $0x6cc] ss:$16 sps:$4 sm:$0xff]  }
 0x1e3   :  { %2245 = vmatprep.subr.bf16.mxu0 %v4167_v59  ;;  %2417 = vmatprep.subr.bf16.mxu1 %v4170_v60  ;;  %v4249_v59 = vld [vmem:[#allocation6 + $0x6c0] ss:$16 sps:$4 sm:$0xff]   ;;  %v4252_v60 = vld [vmem:[#allocation6 + $0x6c8] ss:$16 sps:$4 sm:$0xff]  }
 0x1e6   :  { %2246 = vmatpush1.bf16.msra.mxu0 %v4165_v61  ;;  %2418 = vmatpush1.bf16.msra.mxu1 %v4168_v62  ;;  %v4257_v61 = vld [vmem:[#allocation6 + $0x6e4] ss:$16 sps:$4 sm:$0xff]   ;;  %v4260_v62 = vld [vmem:[#allocation6 + $0x6ec] ss:$16 sps:$4 sm:$0xff]  }
 0x1e7   :  { %2247 = vmatprep.subr.bf16.mxu0 %v4173_v63  ;;  %2419 = vmatprep.subr.bf16.mxu1 %v4176_v1  ;;  %v4255_v63 = vld [vmem:[#allocation6 + $0x6e0] ss:$16 sps:$4 sm:$0xff]   ;;  %v4258_v1 = vld [vmem:[#allocation6 + $0x6e8] ss:$16 sps:$4 sm:$0xff]  }
 0x1ea   :  { %2248 = vmatpush1.bf16.msra.mxu0 %v4171_v2  ;;  %2420 = vmatpush1.bf16.msra.mxu1 %v4174_v3  ;;  %v4263_v2 = vld [vmem:[#allocation6 + $0x704] ss:$16 sps:$4 sm:$0xff]   ;;  %v4266_v3 = vld [vmem:[#allocation6 + $0x70c] ss:$16 sps:$4 sm:$0xff]  }
 0x1eb   :  { %2249 = vmatprep.subr.bf16.mxu0 %v4179_v4  ;;  %2421 = vmatprep.subr.bf16.mxu1 %v4182_v5  ;;  %v4261_v4 = vld [vmem:[#allocation6 + $0x700] ss:$16 sps:$4 sm:$0xff]   ;;  %v4264_v5 = vld [vmem:[#allocation6 + $0x708] ss:$16 sps:$4 sm:$0xff]  }
 0x1ee   :  { %2250 = vmatpush1.bf16.msra.mxu0 %v4177_v10  ;;  %2422 = vmatpush1.bf16.msra.mxu1 %v4180_v11  ;;  %v4269_v10 = vld [vmem:[#allocation6 + $0x724] ss:$16 sps:$4 sm:$0xff]   ;;  %v4272_v11 = vld [vmem:[#allocation6 + $0x72c] ss:$16 sps:$4 sm:$0xff]  }
 0x1ef   :  { %2251 = vmatprep.subr.bf16.mxu0 %v4185_v12  ;;  %2423 = vmatprep.subr.bf16.mxu1 %v4188_v13  ;;  %v4267_v12 = vld [vmem:[#allocation6 + $0x720] ss:$16 sps:$4 sm:$0xff]   ;;  %v4270_v13 = vld [vmem:[#allocation6 + $0x728] ss:$16 sps:$4 sm:$0xff]  }
 0x1f2   :  { %2252 = vmatpush1.bf16.msra.mxu0 %v4183_v14  ;;  %2424 = vmatpush1.bf16.msra.mxu1 %v4186_v15  ;;  %v4275_v14 = vld [vmem:[#allocation6 + $0x744] ss:$16 sps:$4 sm:$0xff]   ;;  %v4278_v15 = vld [vmem:[#allocation6 + $0x74c] ss:$16 sps:$4 sm:$0xff]  }
 0x1f3   :  { %2253 = vmatprep.subr.bf16.mxu0 %v4191_v0  ;;  %2425 = vmatprep.subr.bf16.mxu1 %v4194_v17  ;;  %v4273_v0 = vld [vmem:[#allocation6 + $0x740] ss:$16 sps:$4 sm:$0xff]   ;;  %v4276_v17 = vld [vmem:[#allocation6 + $0x748] ss:$16 sps:$4 sm:$0xff]  }
 0x1f6   :  { %2254 = vmatpush1.bf16.msra.mxu0 %v4189_v18  ;;  %2426 = vmatpush1.bf16.msra.mxu1 %v4192_v19  ;;  %v4281_v18 = vld [vmem:[#allocation6 + $0x764] ss:$16 sps:$4 sm:$0xff]   ;;  %v4284_v19 = vld [vmem:[#allocation6 + $0x76c] ss:$16 sps:$4 sm:$0xff]  }
 0x1f7   :  { %2255 = vmatprep.subr.bf16.mxu0 %v4197_v20  ;;  %2427 = vmatprep.subr.bf16.mxu1 %v4200_v21  ;;  %v4279_v20 = vld [vmem:[#allocation6 + $0x760] ss:$16 sps:$4 sm:$0xff]   ;;  %v4282_v21 = vld [vmem:[#allocation6 + $0x768] ss:$16 sps:$4 sm:$0xff]  }
 0x1fa   :  { %2256 = vmatpush1.bf16.msra.mxu0 %v4195_v8  ;;  %2428 = vmatpush1.bf16.msra.mxu1 %v4198_v22  ;;  %v4287_v8 = vld [vmem:[#allocation6 + $0x784] ss:$16 sps:$4 sm:$0xff]   ;;  %v4290_v22 = vld [vmem:[#allocation6 + $0x78c] ss:$16 sps:$4 sm:$0xff]  }
 0x1fb   :  { %2257 = vmatprep.subr.bf16.mxu0 %v4203_v24  ;;  %2429 = vmatprep.subr.bf16.mxu1 %v4206_v25  ;;  %v4285_v24 = vld [vmem:[#allocation6 + $0x780] ss:$16 sps:$4 sm:$0xff]   ;;  %v4288_v25 = vld [vmem:[#allocation6 + $0x788] ss:$16 sps:$4 sm:$0xff]  }
 0x1fe   :  { %2258 = vmatpush1.bf16.msra.mxu0 %v4201_v27  ;;  %2430 = vmatpush1.bf16.msra.mxu1 %v4204_v28  ;;  %v4293_v27 = vld [vmem:[#allocation6 + $0x7a4] ss:$16 sps:$4 sm:$0xff]   ;;  %v4296_v28 = vld [vmem:[#allocation6 + $0x7ac] ss:$16 sps:$4 sm:$0xff]  }
 0x1ff   :  { %2259 = vmatprep.subr.bf16.mxu0 %v4209_v29  ;;  %2431 = vmatprep.subr.bf16.mxu1 %v4212_v30  ;;  %v4291_v29 = vld [vmem:[#allocation6 + $0x7a0] ss:$16 sps:$4 sm:$0xff]   ;;  %v4294_v30 = vld [vmem:[#allocation6 + $0x7a8] ss:$16 sps:$4 sm:$0xff]  }
 0x202   :  { %2260 = vmatpush1.bf16.msra.mxu0 %v4207_v31  ;;  %2432 = vmatpush1.bf16.msra.mxu1 %v4210_v32  ;;  %v4299_v31 = vld [vmem:[#allocation6 + $0x7c4] ss:$16 sps:$4 sm:$0xff]   ;;  %v4302_v32 = vld [vmem:[#allocation6 + $0x7cc] ss:$16 sps:$4 sm:$0xff]  }
 0x203   :  { %2272 = vmatprep.subr.bf16.mxu0 %v4215_v33  ;;  %2444 = vmatprep.subr.bf16.mxu1 %v4218_v34  ;;  %v4297_v33 = vld [vmem:[#allocation6 + $0x7c0] ss:$16 sps:$4 sm:$0xff]   ;;  %v4300_v34 = vld [vmem:[#allocation6 + $0x7c8] ss:$16 sps:$4 sm:$0xff]  }
 0x205   :  { %2262 = vmatmul.mubr.bf16.vlgmr.msra.gmra.mrb[4].mxu0 %v4857_v52  ;;  %2434 = vmatmul.mubr.bf16.vlgmr.msra.gmra.mrb[12].mxu1 %v4857_v52  ;;  %v4236_v52 = vld [vmem:[#allocation6 + $0x66c] ss:$16 sps:$4 sm:$0xff]  }
 0x206   :  { %2273 = vmatpush1.bf16.msra.mxu0 %v4213_v35  ;;  %2445 = vmatpush1.bf16.msra.mxu1 %v4216_v36  ;;  %v4305_v35 = vld [vmem:[#allocation6 + $0x7e4] ss:$16 sps:$4 sm:$0xff]   ;;  %v4308_v36 = vld [vmem:[#allocation6 + $0x7ec] ss:$16 sps:$4 sm:$0xff]  }
 0x207   :  { %2274 = vmatprep.subr.bf16.mxu0 %v4221_v37  ;;  %2446 = vmatprep.subr.bf16.mxu1 %v4224_v16  ;;  %v4303_v37 = vld [vmem:[#allocation6 + $0x7e0] ss:$16 sps:$4 sm:$0xff]   ;;  %v4306_v16 = vld [vmem:[#allocation6 + $0x7e8] ss:$16 sps:$4 sm:$0xff]  }
 0x208   :  { %2304 = vmatprep.mubr.bf16.mxu0 %v4872_v26  ;;  %2476 = vmatprep.mubr.bf16.mxu1 %v4872_v26  ;;  %v4240_v26 = vld [vmem:[#allocation6 + $0x688] ss:$16 sps:$4 sm:$0xff]  }
 0x20a   :  { %2275 = vmatpush1.bf16.msra.mxu0 %v4219_v39  ;;  %2447 = vmatpush1.bf16.msra.mxu1 %v4222_v40  ;;  %v4311_v39 = vld [vmem:[#allocation9 + $0x4] ss:$8 sps:$4 sm:$0xff]   ;;  %v4309_v40 = vld [vmem:[#allocation9] ss:$8 sps:$4 sm:$0xff]  }
 0x20b   :  { %2276 = vmatprep.subr.bf16.mxu0 %v4227_v41  ;;  %2448 = vmatprep.subr.bf16.mxu1 %v4230_v43  ;;  %v4314_v41 = vld [vmem:[#allocation9 + $0x14] ss:$8 sps:$4 sm:$0xff]   ;;  %v4312_v43 = vld [vmem:[#allocation9 + $0x10] ss:$8 sps:$4 sm:$0xff]  }
 0x20e   :  { %2277 = vmatpush1.bf16.msra.mxu0 %v4225_v44  ;;  %2449 = vmatpush1.bf16.msra.mxu1 %v4228_v54  ;;  %v4317_v44 = vld [vmem:[#allocation9 + $0x24] ss:$8 sps:$4 sm:$0xff]   ;;  %v4315_v54 = vld [vmem:[#allocation9 + $0x20] ss:$8 sps:$4 sm:$0xff]  }
 0x20f   :  { %2278 = vmatprep.subr.bf16.mxu0 %v4233_v45  ;;  %2450 = vmatprep.subr.bf16.mxu1 %v4236_v52  ;;  %v4320_v45 = vld [vmem:[#allocation9 + $0x34] ss:$8 sps:$4 sm:$0xff]   ;;  %v4318_v52 = vld [vmem:[#allocation9 + $0x30] ss:$8 sps:$4 sm:$0xff]  }
 0x212   :  { %2279 = vmatpush1.bf16.msra.mxu0 %v4231_v46  ;;  %2451 = vmatpush1.bf16.msra.mxu1 %v4234_v47  ;;  %v4323_v46 = vld [vmem:[#allocation9 + $0x44] ss:$8 sps:$4 sm:$0xff]   ;;  %v4321_v47 = vld [vmem:[#allocation9 + $0x40] ss:$8 sps:$4 sm:$0xff]  }
 0x213   :  { %2280 = vmatprep.subr.bf16.mxu0 %v4239_v48  ;;  %2452 = vmatprep.subr.bf16.mxu1 %v4242_v49  ;;  %v4326_v48 = vld [vmem:[#allocation9 + $0x54] ss:$8 sps:$4 sm:$0xff]   ;;  %v4324_v49 = vld [vmem:[#allocation9 + $0x50] ss:$8 sps:$4 sm:$0xff]  }
 0x216   :  { %2281 = vmatpush1.bf16.msra.mxu0 %v4237_v50  ;;  %2453 = vmatpush1.bf16.msra.mxu1 %v4240_v26  ;;  %v4327_v50 = vld [vmem:[#allocation9 + $0x60] ss:$8 sps:$4 sm:$0xff]   ;;  %v4332_v26 = vld [vmem:[#allocation9 + $0x74] ss:$8 sps:$4 sm:$0xff]  }
 0x217   :  { %2282 = vmatprep.subr.bf16.mxu0 %v4245_v51  ;;  %2454 = vmatprep.subr.bf16.mxu1 %v4248_v53  ;;  %v4330_v51 = vld [vmem:[#allocation9 + $0x70] ss:$8 sps:$4 sm:$0xff]   ;;  %v4335_v53 = vld [vmem:[#allocation9 + $0x84] ss:$8 sps:$4 sm:$0xff]  }
 0x21a   :  { %2283 = vmatpush1.bf16.msra.mxu0 %v4243_v55  ;;  %2455 = vmatpush1.bf16.msra.mxu1 %v4246_v56  ;;  %v4333_v55 = vld [vmem:[#allocation9 + $0x80] ss:$8 sps:$4 sm:$0xff]   ;;  %v4338_v56 = vld [vmem:[#allocation9 + $0x94] ss:$8 sps:$4 sm:$0xff]  }
 0x21b   :  { %2284 = vmatprep.subr.bf16.mxu0 %v4251_v57  ;;  %2456 = vmatprep.subr.bf16.mxu1 %v4254_v58  ;;  %v4336_v57 = vld [vmem:[#allocation9 + $0x90] ss:$8 sps:$4 sm:$0xff]   ;;  %v4341_v58 = vld [vmem:[#allocation9 + $0xa4] ss:$8 sps:$4 sm:$0xff]  }
 0x21e   :  { %2285 = vmatpush1.bf16.msra.mxu0 %v4249_v59  ;;  %2457 = vmatpush1.bf16.msra.mxu1 %v4252_v60  ;;  %v4339_v59 = vld [vmem:[#allocation9 + $0xa0] ss:$8 sps:$4 sm:$0xff]   ;;  %v4344_v60 = vld [vmem:[#allocation9 + $0xb4] ss:$8 sps:$4 sm:$0xff]  }
 0x21f   :  { %2286 = vmatprep.subr.bf16.mxu0 %v4257_v61  ;;  %2458 = vmatprep.subr.bf16.mxu1 %v4260_v62  ;;  %v4342_v61 = vld [vmem:[#allocation9 + $0xb0] ss:$8 sps:$4 sm:$0xff]   ;;  %v4347_v62 = vld [vmem:[#allocation9 + $0xc4] ss:$8 sps:$4 sm:$0xff]  }
 0x222   :  { %2287 = vmatpush1.bf16.msra.mxu0 %v4255_v63  ;;  %2459 = vmatpush1.bf16.msra.mxu1 %v4258_v1  ;;  %v4345_v63 = vld [vmem:[#allocation9 + $0xc0] ss:$8 sps:$4 sm:$0xff]   ;;  %v4350_v1 = vld [vmem:[#allocation9 + $0xd4] ss:$8 sps:$4 sm:$0xff]  }
 0x223   :  { %2288 = vmatprep.subr.bf16.mxu0 %v4263_v2  ;;  %2460 = vmatprep.subr.bf16.mxu1 %v4266_v3  ;;  %v4348_v2 = vld [vmem:[#allocation9 + $0xd0] ss:$8 sps:$4 sm:$0xff]   ;;  %v4353_v3 = vld [vmem:[#allocation9 + $0xe4] ss:$8 sps:$4 sm:$0xff]  }
 0x226   :  { %2289 = vmatpush1.bf16.msra.mxu0 %v4261_v4  ;;  %2461 = vmatpush1.bf16.msra.mxu1 %v4264_v5  ;;  %v4351_v4 = vld [vmem:[#allocation9 + $0xe0] ss:$8 sps:$4 sm:$0xff]   ;;  %v4356_v5 = vld [vmem:[#allocation9 + $0xf4] ss:$8 sps:$4 sm:$0xff]  }
 0x227   :  { %2290 = vmatprep.subr.bf16.mxu0 %v4269_v10  ;;  %2462 = vmatprep.subr.bf16.mxu1 %v4272_v11  ;;  %v4354_v10 = vld [vmem:[#allocation9 + $0xf0] ss:$8 sps:$4 sm:$0xff]   ;;  %v4359_v11 = vld [vmem:[#allocation9 + $0x104] ss:$8 sps:$4 sm:$0xff]  }
 0x22a   :  { %2291 = vmatpush1.bf16.msra.mxu0 %v4267_v12  ;;  %2463 = vmatpush1.bf16.msra.mxu1 %v4270_v13  ;;  %v4405_v12 = vld [vmem:[%s5009_s7 + $0x40] sm:$0xff]  }
 0x22b   :  { %2292 = vmatprep.subr.bf16.mxu0 %v4275_v14  ;;  %2464 = vmatprep.subr.bf16.mxu1 %v4278_v15  ;;  %v4406_v13 = vld [vmem:[%s5009_s7] sm:$0xff]   ;;  %v4407_v14 = vld [vmem:[%s5009_s7 + $0x48] sm:$0xff]  }
 0x22c   :  { %v4408_v15 = vld [vmem:[%s5009_s7 + $0x8] sm:$0xff]  }
 0x22e   :  { %2293 = vmatpush1.bf16.msra.mxu0 %v4273_v0  ;;  %2465 = vmatpush1.bf16.msra.mxu1 %v4276_v17  ;;  %v4409_v0 = vld [vmem:[%s5009_s7 + $0x50] sm:$0xff]  }
 0x22f   :  { %2294 = vmatprep.subr.bf16.mxu0 %v4281_v18  ;;  %2466 = vmatprep.subr.bf16.mxu1 %v4284_v19  ;;  %v4410_v17 = vld [vmem:[%s5009_s7 + $0x10] sm:$0xff]   ;;  %v4411_v18 = vld [vmem:[%s5009_s7 + $0x58] sm:$0xff]  }
 0x230   :  { %v4412_v19 = vld [vmem:[%s5009_s7 + $0x18] sm:$0xff]  }
 0x232   :  { %2295 = vmatpush1.bf16.msra.mxu0 %v4279_v20  ;;  %2467 = vmatpush1.bf16.msra.mxu1 %v4282_v21  ;;  %v4413_v20 = vld [vmem:[%s5009_s7 + $0x60] sm:$0xff]  }
 0x233   :  { %2296 = vmatprep.subr.bf16.mxu0 %v4287_v8  ;;  %2468 = vmatprep.subr.bf16.mxu1 %v4290_v22  ;;  %v4414_v21 = vld [vmem:[%s5009_s7 + $0x20] sm:$0xff]   ;;  %v4415_v8 = vld [vmem:[%s5009_s7 + $0x68] sm:$0xff]  }
 0x234   :  { %v841_v22 = vld [vmem:[#allocation7] sm:$0xf] }
 0x236   :  { %2297 = vmatpush1.bf16.msra.mxu0 %v4285_v24  ;;  %2469 = vmatpush1.bf16.msra.mxu1 %v4288_v25  ;;  %v846_v24 = vrot.slane %v841_v22, %v4837_v7  ;;  %v854_v25 = vrot.slane %v841_v22, %v190_v38 }
 0x237   :  { %2298 = vmatprep.subr.bf16.mxu0 %v4293_v27  ;;  %2470 = vmatprep.subr.bf16.mxu1 %v4296_v28  ;;  %v850_v27 = vrot.slane %v841_v22, %v4842_v9  ;;  %v858_v28 = vrot.slane %v841_v22, %v194_v42  ;;  %v4404_v22 = vld [vmem:[#allocation9 + $0x1f4] ss:$8 sps:$4 sm:$0xff]  }
 0x23a   :  { %2299 = vmatpush1.bf16.msra.mxu0 %v4291_v29  ;;  %2471 = vmatpush1.bf16.msra.mxu1 %v4294_v30 }
 0x23b   :  { %2300 = vmatprep.subr.bf16.mxu0 %v4299_v31  ;;  %2472 = vmatprep.subr.bf16.mxu1 %v4302_v32 }
 0x23e   :  { %2301 = vmatpush1.bf16.msra.mxu0 %v4297_v33  ;;  %2473 = vmatpush1.bf16.msra.mxu1 %v4300_v34 }
 0x23f   :  { %2302 = vmatprep.subr.bf16.mxu0 %v4305_v35  ;;  %2474 = vmatprep.subr.bf16.mxu1 %v4308_v36 }
 0x242   :  { %2303 = vmatpush1.bf16.msra.mxu0 %v4303_v37  ;;  %2475 = vmatpush1.bf16.msra.mxu1 %v4306_v16 }
 0x243   :  { %2895 = vmatprep.subr.bf16.mxu0 %v4311_v39  ;;  %3799 = vmatprep.subr.bf16.mxu1 %v4405_v12  ;;  %v4384_v12 = vld [vmem:[#allocation9 + $0x190] ss:$8 sps:$4 sm:$0xff]  }
 0x245   :  { %2305 = vmatmul.mubr.bf16.vlgmr.msra.gmra.mrb[4].mxu0 %v4870_v23  ;;  %2477 = vmatmul.mubr.bf16.vlgmr.msra.gmra.mrb[12].mxu1 %v4870_v23  ;;  %v4329_v23 = vld [vmem:[#allocation9 + $0x64] ss:$8 sps:$4 sm:$0xff]  }
 0x246   :  { %2896 = vmatpush1.bf16.msra.mxu0 %v4309_v40  ;;  %3800 = vmatpush3.bf16.msra.mxu1 %v4406_v13  ;;  %v4389_v13 = vld [vmem:[#allocation9 + $0x1a4] ss:$8 sps:$4 sm:$0xff]  }
 0x247   :  { %2897 = vmatprep.subr.bf16.mxu0 %v4314_v41  ;;  %3801 = vmatprep.subr.bf16.mxu1 %v4407_v14  ;;  %v4387_v14 = vld [vmem:[#allocation9 + $0x1a0] ss:$8 sps:$4 sm:$0xff]  }
 0x24a   :  { %2898 = vmatpush1.bf16.msra.mxu0 %v4312_v43  ;;  %3802 = vmatpush3.bf16.msra.mxu1 %v4408_v15  ;;  %v4392_v15 = vld [vmem:[#allocation9 + $0x1b4] ss:$8 sps:$4 sm:$0xff]  }
 0x24b   :  { %2899 = vmatprep.subr.bf16.mxu0 %v4317_v44  ;;  %3803 = vmatprep.subr.bf16.mxu1 %v4409_v0  ;;  %v4390_v0 = vld [vmem:[#allocation9 + $0x1b0] ss:$8 sps:$4 sm:$0xff]  }
 0x24e   :  { %2900 = vmatpush1.bf16.msra.mxu0 %v4315_v54  ;;  %3804 = vmatpush3.bf16.msra.mxu1 %v4410_v17  ;;  %v4395_v17 = vld [vmem:[#allocation9 + $0x1c4] ss:$8 sps:$4 sm:$0xff]  }
 0x24f   :  { %2901 = vmatprep.subr.bf16.mxu0 %v4320_v45  ;;  %3805 = vmatprep.subr.bf16.mxu1 %v4411_v18  ;;  %v4393_v18 = vld [vmem:[#allocation9 + $0x1c0] ss:$8 sps:$4 sm:$0xff]  }
 0x252   :  { %2902 = vmatpush1.bf16.msra.mxu0 %v4318_v52  ;;  %3806 = vmatpush3.bf16.msra.mxu1 %v4412_v19  ;;  %v4398_v19 = vld [vmem:[#allocation9 + $0x1d4] ss:$8 sps:$4 sm:$0xff]  }
 0x253   :  { %2903 = vmatprep.subr.bf16.mxu0 %v4323_v46  ;;  %3807 = vmatprep.subr.bf16.mxu1 %v4413_v20  ;;  %v4396_v20 = vld [vmem:[#allocation9 + $0x1d0] ss:$8 sps:$4 sm:$0xff]  }
 0x256   :  { %2904 = vmatpush1.bf16.msra.mxu0 %v4321_v47  ;;  %3808 = vmatpush3.bf16.msra.mxu1 %v4414_v21  ;;  %v4401_v21 = vld [vmem:[#allocation9 + $0x1e4] ss:$8 sps:$4 sm:$0xff]  }
 0x257   :  { %2905 = vmatprep.subr.bf16.mxu0 %v4326_v48  ;;  %3809 = vmatprep.subr.bf16.mxu1 %v4415_v8  ;;  %v4399_v8 = vld [vmem:[#allocation9 + $0x1e0] ss:$8 sps:$4 sm:$0xff]  }
 0x25a   :  { %2906 = vmatpush1.bf16.msra.mxu0 %v4324_v49 }
 0x25b   :  { %2907 = vmatprep.subr.bf16.mxu0 %v4329_v23 }
 0x25e   :  { %2908 = vmatpush1.bf16.msra.mxu0 %v4327_v50 }
 0x25f   :  { %2909 = vmatprep.subr.bf16.mxu0 %v4332_v26 }
 0x262   :  { %2910 = vmatpush1.bf16.msra.mxu0 %v4330_v51  ;;  %v4357_v51 = vld [vmem:[#allocation9 + $0x100] ss:$8 sps:$4 sm:$0xff]  }
 0x263   :  { %2911 = vmatprep.subr.bf16.mxu0 %v4335_v53  ;;  %v4362_v53 = vld [vmem:[#allocation9 + $0x114] ss:$8 sps:$4 sm:$0xff]  }
 0x266   :  { %2912 = vmatpush1.bf16.msra.mxu0 %v4333_v55  ;;  %v4360_v55 = vld [vmem:[#allocation9 + $0x110] ss:$8 sps:$4 sm:$0xff]  }
 0x267   :  { %2913 = vmatprep.subr.bf16.mxu0 %v4338_v56  ;;  %v4365_v56 = vld [vmem:[#allocation9 + $0x124] ss:$8 sps:$4 sm:$0xff]  }
 0x26a   :  { %2914 = vmatpush1.bf16.msra.mxu0 %v4336_v57  ;;  %v4363_v57 = vld [vmem:[#allocation9 + $0x120] ss:$8 sps:$4 sm:$0xff]  }
 0x26b   :  { %2915 = vmatprep.subr.bf16.mxu0 %v4341_v58  ;;  %v4368_v58 = vld [vmem:[#allocation9 + $0x134] ss:$8 sps:$4 sm:$0xff]  }
 0x26e   :  { %2916 = vmatpush1.bf16.msra.mxu0 %v4339_v59  ;;  %v4366_v59 = vld [vmem:[#allocation9 + $0x130] ss:$8 sps:$4 sm:$0xff]  }
 0x26f   :  { %2917 = vmatprep.subr.bf16.mxu0 %v4344_v60  ;;  %v4371_v60 = vld [vmem:[#allocation9 + $0x144] ss:$8 sps:$4 sm:$0xff]  }
 0x272   :  { %2918 = vmatpush1.bf16.msra.mxu0 %v4342_v61  ;;  %v4369_v61 = vld [vmem:[#allocation9 + $0x140] ss:$8 sps:$4 sm:$0xff]  }
 0x273   :  { %2919 = vmatprep.subr.bf16.mxu0 %v4347_v62  ;;  %v4374_v62 = vld [vmem:[#allocation9 + $0x154] ss:$8 sps:$4 sm:$0xff]  }
 0x276   :  { %2920 = vmatpush1.bf16.msra.mxu0 %v4345_v63  ;;  %v4372_v63 = vld [vmem:[#allocation9 + $0x150] ss:$8 sps:$4 sm:$0xff]  }
 0x277   :  { %2921 = vmatprep.subr.bf16.mxu0 %v4350_v1  ;;  %v4377_v1 = vld [vmem:[#allocation9 + $0x164] ss:$8 sps:$4 sm:$0xff]  }
 0x27a   :  { %2922 = vmatpush1.bf16.msra.mxu0 %v4348_v2  ;;  %v4375_v2 = vld [vmem:[#allocation9 + $0x160] ss:$8 sps:$4 sm:$0xff]  }
 0x27b   :  { %2923 = vmatprep.subr.bf16.mxu0 %v4353_v3  ;;  %v4380_v3 = vld [vmem:[#allocation9 + $0x174] ss:$8 sps:$4 sm:$0xff]  }
 0x27e   :  { %2924 = vmatpush1.bf16.msra.mxu0 %v4351_v4  ;;  %v4378_v4 = vld [vmem:[#allocation9 + $0x170] ss:$8 sps:$4 sm:$0xff]  }
 0x27f   :  { %2925 = vmatprep.subr.bf16.mxu0 %v4356_v5  ;;  %v4383_v5 = vld [vmem:[#allocation9 + $0x184] ss:$8 sps:$4 sm:$0xff]  }
 0x282   :  { %2926 = vmatpush1.bf16.msra.mxu0 %v4354_v10  ;;  %v4381_v10 = vld [vmem:[#allocation9 + $0x180] ss:$8 sps:$4 sm:$0xff]  }
 0x283   :  { %2938 = vmatprep.subr.bf16.mxu0 %v4359_v11  ;;  %v4386_v11 = vld [vmem:[#allocation9 + $0x194] ss:$8 sps:$4 sm:$0xff]  }
 0x318   :  { %v2306_v29 = vpop.f32.mrb[4].mxu0  ;;  %v2478_v30 = vpop.f32.mrb[12].mxu1 }
 0x319   :  { %v3867_v31 = vadd.f32 %v2306_v29, %v846_v24  ;;  %v3871_v32 = vadd.f32 %v2478_v30, %v854_v25  ;;  %v2308_v33 = vpop.f32.mrb[5].mxu0  ;;  %v2480_v34 = vpop.f32.mrb[13].mxu1  ;;  %v4419_v29 = vld [vmem:[%s5009_s7 + $0x78] sm:$0xff]  }
 0x31a   :  { %v3868_v35 = vadd.f32 %v2308_v33, %v850_v27  ;;  %v3872_v36 = vadd.f32 %v2480_v34, %v858_v28  ;;  %v2310_v37 = vpop.f32.mrb[6].mxu0  ;;  %v2482_v16 = vpop.f32.mrb[14].mxu1  ;;  %v4420_v30 = vld [vmem:[%s5009_s7 + $0x38] sm:$0xff]  }
 0x31b   :  { %v3869_v39 = vadd.f32 %v2310_v37, %v846_v24  ;;  %v3873_v40 = vadd.f32 %v2482_v16, %v854_v25  ;;  %v2312_v41 = vpop.f32.mrb[7].mxu0  ;;  %v2484_v43 = vpop.f32.mrb[15].mxu1  ;;  %v2487_v54 = vmax.f32 %v3867_v31, 0.0  ;;  %v2489_v45 = vmax.f32 %v3871_v32, 0.0  ;;  %v4402_v24 = vld [vmem:[#allocation9 + $0x1f0] ss:$8 sps:$4 sm:$0xff]  }
 0x31c   :  { %v3870_v38 = vadd.f32 %v2312_v41, %v850_v27  ;;  %v3874_v44 = vadd.f32 %v2484_v43, %v858_v28  ;;  %v2488_v52 = vmax.f32 %v3868_v35, 0.0  ;;  %v2490_v46 = vmax.f32 %v3872_v36, 0.0  ;;  %v4416_v25 = vld [vmem:[%s5009_s7 + $0x28] sm:$0xff]   ;;  %v4417_v27 = vld [vmem:[%s5009_s7 + $0x70] sm:$0xff]   ;;  %v2563_v32 = vld [vmem:[%s5008_s6] sm:$0x3] }
 0x31d   :  { %v2491_v6 = vmax.f32 %v3869_v39, 0.0  ;;  %v2493_v42 = vmax.f32 %v3873_v40, 0.0  ;;  %3810 = vmatpush3.bf16.msra.mxu1 %v4416_v25  ;;  %v4418_v28 = vld [vmem:[%s5009_s7 + $0x30] sm:$0xff]   ;;  %v4642_v31 = vmov 0.0   ;;  %v2568_v33 = vrot.slane %v2563_v32, %v4837_v7  ;;  %v4421_v7 = vld [vmem:[%s5011_s9] sm:$0xff]  }
 0x31e   :  { %v2492_v47 = vmax.f32 %v3870_v38, 0.0  ;;  %v2494_v48 = vmax.f32 %v3874_v44, 0.0  ;;  %3811 = vmatprep.subr.bf16.mxu1 %v4417_v27  ;;  %v2572_v34 = vrot.slane %v2563_v32, %v4842_v9  ;;  %v4422_v9 = vld [vmem:[%s5011_s9 + $0x8] sm:$0xff]  }
 0x31f   :  { %v2495_v49 = vpack.c.bf16 %v2491_v6, %v2487_v54  ;;  %v4923_v23 = vpack.c.bf16 %v2493_v42, %v2489_v45 }
 0x320   :  { %v2496_v50 = vpack.c.bf16 %v2492_v47, %v2488_v52  ;;  %v2498_v26 = vpack.c.bf16 %v2494_v48, %v2490_v46  ;;  %v4423_v52 = vld [vmem:[%s5011_s9 + $0x10] sm:$0xff]   ;;  %v4424_v46 = vld [vmem:[%s5011_s9 + $0x18] sm:$0xff]   ;;  %v4425_v47 = vld [vmem:[%s5011_s9 + $0x20] sm:$0xff]  }
 0x321   :  { %3812 = vmatpush3.bf16.msra.mxu1 %v4418_v28  ;;  %v4426_v48 = vld [vmem:[%s5011_s9 + $0x28] sm:$0xff]  }
 0x322   :  { %2927 = vmatprep.mubr.bf16.mxu0 %v2496_v50  ;;  %3813 = vmatprep.subr.bf16.mxu1 %v4419_v29 }
 0x323   :  { %2928 = vmatmul.mubr.bf16.vlgmr.msra.gmra.mrb[8].mxu0 %v2495_v49  ;;  %v4427_v49 = vld [vmem:[%s5011_s9 + $0x30] sm:$0xff]  }
 0x324   :  { %2939 = vmatpush1.bf16.msra.mxu0 %v4357_v51  ;;  %2970 = vmatprep.mubr.bf16.mxu0 %v2498_v26  ;;  %v3758_v26 = vld [vmem:[#allocation10] ss:$0 sm:$0xff] }
 0x325   :  { %2940 = vmatprep.subr.bf16.mxu0 %v4362_v53  ;;  %3814 = vmatpush3.bf16.msra.mxu1 %v4420_v30 }
 0x326   :  { %3835 = vmatprep.subr.bf16.mxu1 %v4642_v31 }
 0x328   :  { %2941 = vmatpush1.bf16.msra.mxu0 %v4360_v55 }
 0x329   :  { %2942 = vmatprep.subr.bf16.mxu0 %v4365_v56 }
 0x32c   :  { %2943 = vmatpush1.bf16.msra.mxu0 %v4363_v57 }
 0x32d   :  { %2944 = vmatprep.subr.bf16.mxu0 %v4368_v58 }
 0x330   :  { %2945 = vmatpush1.bf16.msra.mxu0 %v4366_v59 }
 0x331   :  { %2946 = vmatprep.subr.bf16.mxu0 %v4371_v60 }
 0x334   :  { %2947 = vmatpush1.bf16.msra.mxu0 %v4369_v61 }
 0x335   :  { %2948 = vmatprep.subr.bf16.mxu0 %v4374_v62  ;;  %v4429_v62 = vld [vmem:[%s5013_s11] sm:$0xff]  }
 0x338   :  { %2949 = vmatpush1.bf16.msra.mxu0 %v4372_v63 }
 0x339   :  { %2950 = vmatprep.subr.bf16.mxu0 %v4377_v1  ;;  %v4430_v1 = vld [vmem:[%s5013_s11 + $0x8] sm:$0xff]  }
 0x33c   :  { %2951 = vmatpush1.bf16.msra.mxu0 %v4375_v2  ;;  %v4431_v2 = vld [vmem:[%s5013_s11 + $0x10] sm:$0xff]  }
 0x33d   :  { %2952 = vmatprep.subr.bf16.mxu0 %v4380_v3  ;;  %v4432_v3 = vld [vmem:[%s5013_s11 + $0x18] sm:$0xff]  }
 0x340   :  { %2953 = vmatpush1.bf16.msra.mxu0 %v4378_v4  ;;  %v3775_v4 = vld [vmem:[#allocation12] ss:$0 sm:$0xff] }
 0x341   :  { %2954 = vmatprep.subr.bf16.mxu0 %v4383_v5 }
 0x344   :  { %2955 = vmatpush1.bf16.msra.mxu0 %v4381_v10 }
 0x345   :  { %2956 = vmatprep.subr.bf16.mxu0 %v4386_v11 }
 0x348   :  { %2957 = vmatpush1.bf16.msra.mxu0 %v4384_v12 }
 0x349   :  { %2958 = vmatprep.subr.bf16.mxu0 %v4389_v13 }
 0x34c   :  { %2959 = vmatpush1.bf16.msra.mxu0 %v4387_v14 }
 0x34d   :  { %2960 = vmatprep.subr.bf16.mxu0 %v4392_v15 }
 0x350   :  { %2961 = vmatpush1.bf16.msra.mxu0 %v4390_v0 }
 0x351   :  { %2962 = vmatprep.subr.bf16.mxu0 %v4395_v17 }
 0x354   :  { %2963 = vmatpush1.bf16.msra.mxu0 %v4393_v18  ;;  %v3784_v18 = vld [vmem:[#allocation13] ss:$0 sm:$0xff] }
 0x355   :  { %2964 = vmatprep.subr.bf16.mxu0 %v4398_v19 }
 0x358   :  { %2965 = vmatpush1.bf16.msra.mxu0 %v4396_v20 }
 0x359   :  { %2966 = vmatprep.subr.bf16.mxu0 %v4401_v21 }
 0x35c   :  { %2967 = vmatpush1.bf16.msra.mxu0 %v4399_v8 }
 0x35d   :  { %2968 = vmatprep.subr.bf16.mxu0 %v4404_v22 }
 0x360   :  { %2969 = vmatpush1.bf16.msra.mxu0 %v4402_v24 }
 0x363   :  { %2971 = vmatmul.mubr.bf16.vlgmr.msra.gmra.mrb[8].mxu0 %v4923_v23  ;;  %v4428_v23 = vld [vmem:[%s5011_s9 + $0x38] sm:$0xff]  }
 0x436   :  { %v2972_v35 = vpop.f32.mrb[8].mxu0 }
 0x437   :  { %v3875_v36 = vadd.f32 %v2972_v35, %v2568_v33  ;;  %v2974_v37 = vpop.f32.mrb[9].mxu0 }
 0x438   :  { %v3876_v16 = vadd.f32 %v2974_v37, %v2572_v34  ;;  %v2976_v39 = vpop.f32.mrb[10].mxu0 }
 0x439   :  { %v3877_v40 = vadd.f32 %v2976_v39, %v2568_v33  ;;  %v2978_v41 = vpop.f32.mrb[11].mxu0  ;;  %v2981_v38 = vmax.f32 %v3875_v36, 0.0 }
 0x43a   :  { %v3878_v43 = vadd.f32 %v2978_v41, %v2572_v34  ;;  %v2982_v54 = vmax.f32 %v3876_v16, 0.0 }
 0x43b   :  { %v2983_v44 = vmax.f32 %v3877_v40, 0.0 }
 0x43c   :  { %v2984_v45 = vmax.f32 %v3878_v43, 0.0 }
 0x43d   :  { %v2985_v6 = vpack.c.bf16 %v2983_v44, %v2981_v38 }
 0x43e   :  { %v2986_v42 = vpack.c.bf16 %v2984_v45, %v2982_v54 }
 0x440   :  { %3154 = vmatprep.mubr.bf16.mxu1 %v2986_v42 }
 0x441   :  { %3155 = vmatmul.mubr.bf16.vlgmr.msra.gmra.mrb[16].mxu1 %v2985_v6 }
 0x442   :  { %3836 = vmatpush3.bf16.msra.mxu1 %v4421_v7  ;;  %3851 = vmatprep.mubr.msk.bf16.mxu1 %vm4643_vm1, %v4642_v31 }
 0x443   :  { %3837 = vmatprep.subr.bf16.mxu1 %v4642_v31 }
 0x446   :  { %3838 = vmatpush3.bf16.msra.mxu1 %v4422_v9 }
 0x447   :  { %3839 = vmatprep.subr.bf16.mxu1 %v4642_v31 }
 0x44a   :  { %3840 = vmatpush3.bf16.msra.mxu1 %v4423_v52 }
 0x44b   :  { %3841 = vmatprep.subr.bf16.mxu1 %v4642_v31 }
 0x44e   :  { %3842 = vmatpush3.bf16.msra.mxu1 %v4424_v46 }
 0x44f   :  { %3843 = vmatprep.subr.bf16.mxu1 %v4642_v31 }
 0x452   :  { %3844 = vmatpush3.bf16.msra.mxu1 %v4425_v47 }
 0x453   :  { %3845 = vmatprep.subr.bf16.mxu1 %v4642_v31 }
 0x456   :  { %3846 = vmatpush3.bf16.msra.mxu1 %v4426_v48 }
 0x457   :  { %3847 = vmatprep.subr.bf16.mxu1 %v4642_v31 }
 0x45a   :  { %3848 = vmatpush3.bf16.msra.mxu1 %v4427_v49 }
 0x45b   :  { %3849 = vmatprep.subr.bf16.mxu1 %v4642_v31 }
 0x45e   :  { %3850 = vmatpush3.bf16.msra.mxu1 %v4428_v23 }
 0x45f   :  { %3855 = vmatprep.subr.bf16.mxu1 %v4642_v31 }
 0x514   :  { %v3815_v50 = vpop.f32.mrb[16].mxu1 }
 0x515   :  { %v3816_v51 = vpop.f32.mrb[17].mxu1 }
 0x516   :  { %v3817_v53 = vadd.f32 %v3816_v51, %v3815_v50  ;;  %v3818_v55 = vpop.f32.mrb[18].mxu1 }
 0x517   :  { %v3819_v56 = vpop.f32.mrb[19].mxu1 }
 0x518   :  { %v3157_v57 = vadd.f32 %v3817_v53, %v3758_v26  ;;  %v3820_v58 = vadd.f32 %v3819_v56, %v3818_v55 }
 0x51a   :  { %v3160_v59 = vadd.f32 %v3820_v58, %v3758_v26  ;;  %v3163_v60 = vmax.f32 %v3157_v57, 0.0 }
 0x51c   :  { %v3164_v61 = vmax.f32 %v3160_v59, 0.0 }
 0x51e   :  { %v3165_v63 = vpack.c.bf16 %v3164_v61, %v3163_v60 }
 0x520   :  { %3852 = vmatmul.mubr.bf16.vlgmr.msra.gmra.mrb[20].mxu1 %v3165_v63 }
 0x521   :  { %3856 = vmatpush3.bf16.msra.mxu1 %v4429_v62  ;;  %3863 = vmatprep.mubr.msk.bf16.mxu1 %vm4643_vm1, %v4642_v31 }
 0x522   :  { %3857 = vmatprep.subr.bf16.mxu1 %v4642_v31 }
 0x525   :  { %3858 = vmatpush3.bf16.msra.mxu1 %v4430_v1 }
 0x526   :  { %3859 = vmatprep.subr.bf16.mxu1 %v4642_v31 }
 0x529   :  { %3860 = vmatpush3.bf16.msra.mxu1 %v4431_v2 }
 0x52a   :  { %3861 = vmatprep.subr.bf16.mxu1 %v4642_v31 }
 0x52d   :  { %3862 = vmatpush3.bf16.msra.mxu1 %v4432_v3 }
 0x5f3   :  { %v3271_v5 = vpop.f32.mrb[20].mxu1 }
 0x5f4   :  { %v3272_v10 = vadd.f32 %v3775_v4, %v3271_v5  ;;  %v3853_v11 = vpop.f32.mrb[21].mxu1 }
 0x5f5   :  { %v3274_v12 = vpop.f32.mrb[22].mxu1 }
 0x5f6   :  { %v3275_v13 = vadd.f32 %v3775_v4, %v3274_v12  ;;  %v3854_v14 = vpop.f32.mrb[23].mxu1  ;;  %v3278_v15 = vmax.f32 %v3272_v10, 0.0 }
 0x5f8   :  { %v3279_v0 = vmax.f32 %v3275_v13, 0.0 }
 0x5fa   :  { %v3280_v17 = vpack.c.bf16 %v3279_v0, %v3278_v15 }
 0x5fc   :  { %3864 = vmatmul.mubr.msk.bf16.vlgmr.msra.gmra.mrb[24].mxu1 %vm385_vm0, %v3280_v17 }
 0x6cf   :  { %v3357_v19 = vpop.f32.mrb[24].mxu1 }
 0x6d0   :  { %v3358_v20 = vadd.f32 %v3784_v18, %v3357_v19  ;;  %v3865_v21 = vpop.f32.mrb[25].mxu1 }
 0x6d1   :  { %v3360_v8 = vpop.f32.mrb[26].mxu1 }
 0x6d2   :  { %3364 = vmax.xlane.f32.xlu0 %v3358_v20  ;;  %v3866_v22 = vpop.f32.mrb[27].mxu1  ;;  %v3361_v24 = vadd.f32 %v3784_v18, %v3360_v8 }
 0x6d6   :  { %3366 = vmax.xlane.f32.xlu0 %v3361_v24 }
 0x75f   :  { %v3365_v25 = vpop.xlane.xlu0 %3364 }
 0x760   :  { %v3368_v27 = vsub.f32 %v3358_v20, %v3365_v25 }
 0x762   :  { %v3370_v28 = vmul.f32 1.442695, %v3368_v27 }
 0x763   :  { %v3367_v29 = vpop.xlane.xlu0 %3366 }
 0x764   :  { %4433 = vpow2.f32 %v3370_v28  ;;  %v3369_v30 = vsub.f32 %v3361_v24, %v3367_v29 }
 0x766   :  { %v3372_v31 = vmul.f32 1.442695, %v3369_v30 }
 0x768   :  { %4435 = vpow2.f32 %v3372_v31 }
 0x76e   :  { %v4434_v32 = vpop.eup %4433 }
 0x76f   :  { %3374 = vadd.xlane.f32.xlu1 %v4434_v32 }
 0x772   :  { %v4436_v33 = vpop.eup %4435 }
 0x773   :  { %3376 = vadd.xlane.f32.xlu1 %v4436_v33 }
 0x7fc   :  { %v3375_v34 = vpop.xlane.xlu1 %3374 }
 0x7fd   :  { %4437 = vrcp.f32 %v3375_v34 }
 0x800   :  { %v3377_v35 = vpop.xlane.xlu1 %3376 }
 0x801   :  { %4439 = vrcp.f32 %v3377_v35 }
 0x807   :  { %v4438_v36 = vpop.eup %4437 }
 0x808   :  { %v3379_v16 = vmul.f32 %v4438_v36, %v4434_v32 }
 0x80b   :  { %v4440_v37 = vpop.eup %4439 }
 0x80c   :  { %v3381_v39 = vmul.f32 %v4440_v37, %v4436_v33 }
 0x80e   :  { %v3797_v40 = vpack.c.bf16 %v3381_v39, %v3379_v16 }
 0x810   :  { %3798 = vst [vmem:[%s5015_s13] sm:$0xff] %v3797_v40  }
 0x811   :  { %3396 = vsyncpa [#allocation3], 1 }
 0x812   :  { %3397 = vsyncpa [#allocation5], 1 }
 0x813   :  { %3398 = vsyncpa [#allocation8], 1 }
 0x814   :  { %3399 = vsyncpa [#allocation11], 1 }
 0x815   :  { %3400 = vsyncpa [#allocation14], 1 }

</bundles_post_ra>
